<compile_context>
chip_gen: v7x
topology: tpu7x:2x2x1
jax: 0.10.0
libtpu: 0.0.40
codegen_flags: <defaults>
</compile_context>

<pallas_src>
import functools
import math

import jax
import jax.numpy as jnp
import numpy as np
from jax.experimental import pallas as pl
from jax.experimental.pallas import tpu as pltpu


# ----------------------------- Pallas kernel --------------------------------
def _att_layer_kernel(x_ref, pm_ref, wqkv_ref, bqkv_ref, woT_ref, bo_ref,
                      o_ref, qkv_scr, out_scr, *, c1, c2, c3, L, bt):
    # x_ref   : (q_dim, bt*L)   batch block, channel-major, batch folded in lanes
    # pm_ref  : (1, bt*L)       padding mask row (= mask[:, 0:1, :])
    # wqkv_ref: (c1+c2+c3, q_dim) bf16, Q rows pre-scaled by 1/sqrt(c1)
    # bqkv_ref: (c1+c2+c3, 1)   f32 bias (Q rows pre-scaled)
    # woT_ref : (c3, v_dim)     bf16
    # bo_ref  : (1, v_dim)      f32
    # o_ref   : (v_dim, bt*L)
    # qkv_scr : (c1+c2+c3, bt*L) f32 VMEM scratch
    # out_scr : (bt*L, c3)       bf16 VMEM scratch

    # ---- fused QKV projection over the whole batch block: one wide matmul ----
    x_bf = x_ref[...].astype(jnp.bfloat16)
    qkv = jnp.dot(wqkv_ref[...], x_bf, preferred_element_type=jnp.float32)
    qkv_scr[...] = qkv + bqkv_ref[...]

    # ---- per-batch-element attention; fori_loop bounds vreg live ranges ------
    def body(bi, carry):
        start = pl.multiple_of(bi * L, L)
        q = qkv_scr[0:c1, pl.ds(start, L)]                        # (c1, L), scaled
        k = qkv_scr[c1:c1 + c2, pl.ds(start, L)]                  # (c2, L)
        v = qkv_scr[c1 + c2:c1 + c2 + c3, pl.ds(start, L)]        # (c3, L)
        pm = pm_ref[0:1, pl.ds(start, L)]                         # (1, L)

        # energy/sqrt(c1) = q_scaled^T @ k in native layout (tiny vxpose only)
        qT = jnp.transpose(q).astype(jnp.bfloat16)                # (L, c1)
        scores = jnp.dot(qT, k.astype(jnp.bfloat16),
                         preferred_element_type=jnp.float32)      # (L, L)
        scores = scores + jnp.log(pm + 1e-6)                      # key-mask bias (EUP)

        # softmax over keys (f32)
        scores = scores - jnp.max(scores, axis=-1, keepdims=True)
        p = jnp.exp(scores)
        denom = jnp.sum(p, axis=-1, keepdims=True)
        att = p * pl.reciprocal(denom, approx=False)              # exact, (L,1) only
        att = att * pm                                            # zero masked keys

        # out^T = att @ v^T  (no (L, L) transpose), relu, stash for fused conv_out
        vT = jnp.transpose(v).astype(jnp.bfloat16)                # (L, c3)
        outT = jnp.dot(att.astype(jnp.bfloat16), vT,
                       preferred_element_type=jnp.float32)        # (L, c3)
        out_scr[pl.ds(start, L), :] = jnp.maximum(outT, 0.0).astype(out_scr.dtype)
        return carry

    jax.lax.fori_loop(0, bt, body, 0, unroll=True)

    # ---- fused output 1x1 conv: one matmul, one transpose, lane-dense store ----
    finT = jnp.dot(out_scr[...], woT_ref[...],
                   preferred_element_type=jnp.float32) + bo_ref[...]   # (bt*L, v_dim)
    fin = jnp.transpose(finT) * pm_ref[...]                            # (v_dim, bt*L)
    o_ref[...] = fin.astype(o_ref.dtype)


# ------------------------------- wrapper -------------------------------------
def _num_tensorcores_per_device():
    """Best-effort TC-per-device count (v5e / v6e = 1; v4 / v5p / v7x = 2)."""
    try:
        kind = jax.devices()[0].device_kind.lower()
    except Exception:
        return 1
    single_tc = ("v5e" in kind or "v5 lite" in kind or "v5litepod" in kind
                 or "v6e" in kind or "v6 lite" in kind)
    return 1 if single_tc else 2


def _vmem_capacity_bytes():
    try:
        return int(pltpu.get_tpu_info().vmem_capacity_bytes)
    except Exception:
        return 64 << 20        # conservative default (v7x physical per-TC VMEM)


def _choose_batch_block(B, L, q_dim, c_sum, v_dim, n_cores, vmem_budget_bytes):
    """Largest bt dividing B that fits VMEM; 1 grid step on single-TC chips,
    an even number of steps on 2-TC chips so both TensorCores get work."""
    fixed = 4 * L * L * 4                    # one element's live scores/p/att tiles
    per_elem = (2 * q_dim * L * 4            # x block (f32, 2x double-buffered)
                + 2 * 1 * L * 4              # padding-mask block (2x)
                + 2 * v_dim * L * 4          # output block (2x)
                + c_sum * L * 4              # fused qkv scratch (f32)
                + 128 * L * 2)               # out^T scratch (bf16, lane-padded)
    cap = max(1, (vmem_budget_bytes - fixed) // per_elem)
    target_steps = n_cores if n_cores > 1 else 1
    bt = max(1, min(cap, max(1, B // target_steps)))
    while B % bt != 0:                        # full blocks only
        bt -= 1
    return bt


def att_layer_forward(x1, mask, params):
    """x1: (B, q_dim, L) float32, mask: (B, 1, L) float32 -> (B, v_dim, L)."""
    B, q_dim, L = x1.shape
    wq, bq, wk, bk, wv, bv, wo, bo = params
    c1, c2, c3 = wq.shape[0], wk.shape[0], wv.shape[0]
    v_dim = wo.shape[0]
    c_sum = c1 + c2 + c3
    if L % 128 != 0:
        raise NotImplementedError("normal_att kernel assumes L % 128 == 0")

    inv_sqrt_c1 = 1.0 / math.sqrt(c1)
    # fused / pre-scaled / pre-transposed parameters (bf16 operands, f32 biases)
    wqkv = jnp.concatenate([wq * inv_sqrt_c1, wk, wv], axis=0).astype(jnp.bfloat16)
    bqkv = jnp.concatenate([bq * inv_sqrt_c1, bk, bv], axis=0).astype(jnp.float32)
    woT = jnp.transpose(wo).astype(jnp.bfloat16)            # (c3, v_dim)
    bo_row = jnp.reshape(bo, (1, v_dim)).astype(jnp.float32)

    # layout plumbing: channel-major, batch folded into the lane (last) dim
    x_wide = jnp.transpose(x1, (1, 0, 2)).reshape(q_dim, B * L)
    pm_wide = mask[:, 0:1, :].astype(jnp.float32).reshape(1, B * L)

    n_cores = _num_tensorcores_per_device()
    vmem_cap = _vmem_capacity_bytes()
    vmem_limit = int(min(vmem_cap * 3 // 4, 100 << 20))
    bt = _choose_batch_block(B, L, q_dim, c_sum, v_dim, n_cores,
                             vmem_budget_bytes=vmem_limit - (2 << 20))
    grid = (B // bt,)

    full = lambda a: pl.BlockSpec(a.shape, lambda b: (0,) * a.ndim)
    kernel = functools.partial(_att_layer_kernel, c1=c1, c2=c2, c3=c3, L=L, bt=bt)

    out_wide = pl.pallas_call(
        kernel,
        out_shape=jax.ShapeDtypeStruct((v_dim, B * L), jnp.float32),
        grid_spec=pltpu.PrefetchScalarGridSpec(
            num_scalar_prefetch=0,
            grid=grid,
            in_specs=[
                pl.BlockSpec((q_dim, bt * L), lambda b: (0, b)),   # x block
                pl.BlockSpec((1, bt * L), lambda b: (0, b)),       # padding mask
                full(wqkv), full(bqkv), full(woT), full(bo_row),
            ],
            out_specs=pl.BlockSpec((v_dim, bt * L), lambda b: (0, b)),
            scratch_shapes=[
                pltpu.VMEM((c_sum, bt * L), jnp.float32),          # fused q/k/v
                pltpu.VMEM((bt * L, c3), jnp.bfloat16),            # relu(out)^T
            ],
        ),
        compiler_params=pltpu.CompilerParams(
            dimension_semantics=("parallel",),
            vmem_limit_bytes=vmem_limit),
    )(x_wide, pm_wide, wqkv, bqkv, woT, bo_row)

    return jnp.transpose(out_wide.reshape(v_dim, B, L), (1, 0, 2))


# --------------------------- pure-JAX reference -------------------------------
def att_layer_reference(x1, mask, params):
    wq, bq, wk, bk, wv, bv, wo, bo = params
    c1 = wq.shape[0]
    q = jnp.einsum('oc,bcl->bol', wq, x1) + bq[None]
    k = jnp.einsum('oc,bcl->bol', wk, x1) + bk[None]
    v = jnp.einsum('oc,bcl->bol', wv, x1) + bv[None]
    pm = mask[:, 0:1, :]                                      # (B, 1, L)
    energy = jnp.einsum('bci,bcj->bij', q, k)
    att = energy / math.sqrt(c1) + jnp.log(pm + 1e-6)
    att = jax.nn.softmax(att, axis=-1)
    att = att * pm
    out = jnp.einsum('bcj,bij->bci', v, att)
    out = jnp.maximum(out, 0.0)
    out = jnp.einsum('oc,bcl->bol', wo, out) + bo[None]
    return out * pm


# ---------------------------------- main --------------------------------------
if __name__ == "__main__":
    # module hyper-params (matching _AttLayer __init__)
    q_dim = k_dim = v_dim = 32
    r1 = r2 = r3 = 2
    bl = 16                       # unused for 'normal_att'
    B, L = 4, 128
    c1, c2, c3 = q_dim // r1, k_dim // r2, v_dim // r3

    key = jax.random.PRNGKey(0)
    ks = jax.random.split(key, 10)

    def conv1d_params(kw, kb, c_out, c_in):
        # PyTorch Conv1d default init: U(-1/sqrt(fan_in), 1/sqrt(fan_in))
        bound = 1.0 / math.sqrt(c_in)
        w = jax.random.uniform(kw, (c_out, c_in), jnp.float32, -bound, bound)
        b = jax.random.uniform(kb, (c_out, 1), jnp.float32, -bound, bound)
        return w, b

    wq, bq = conv1d_params(ks[0], ks[1], c1, q_dim)
    wk, bk = conv1d_params(ks[2], ks[3], c2, k_dim)
    wv, bv = conv1d_params(ks[4], ks[5], c3, v_dim)
    wo, bo = conv1d_params(ks[6], ks[7], v_dim, c3)
    params = (wq, bq, wk, bk, wv, bv, wo, bo)

    x1 = jax.random.normal(ks[8], (B, q_dim, L), jnp.float32)
    # binary padding mask; the module uses mask[:, 0:1, :]
    mask = (jax.random.uniform(ks[9], (B, 1, L)) < 0.8).astype(jnp.float32)

    out = jax.block_until_ready(att_layer_forward(x1, mask, params))
    ref = att_layer_reference(x1, mask, params)

    # bf16 matmul operands (f32 accumulation) -> loosened tolerance
    np.testing.assert_allclose(np.asarray(out), np.asarray(ref),
                               rtol=2e-2, atol=2e-2)

    print("KERNEL_OK")
</pallas_src>

<mosaic_0001>
module attributes {stable_mosaic.version = 11 : i64} {
  func.func @_att_layer_kernel(%arg0: i32, %arg1: memref<32x256xf32, #tpu.memory_space<vmem>>, %arg2: memref<1x256xf32, #tpu.memory_space<vmem>>, %arg3: memref<48x32xbf16, #tpu.memory_space<vmem>>, %arg4: memref<48x1xf32, #tpu.memory_space<vmem>>, %arg5: memref<16x32xbf16, #tpu.memory_space<vmem>>, %arg6: memref<1x32xf32, #tpu.memory_space<vmem>>, %arg7: memref<32x256xf32, #tpu.memory_space<vmem>>, %arg8: memref<48x256xf32, #tpu.memory_space<vmem>>, %arg9: memref<256x16xbf16, #tpu.memory_space<vmem>>) attributes {dimension_semantics = [#tpu.dimension_semantics<parallel>], iteration_bounds = array<i64: 2>, scalar_prefetch = 0 : i64, scratch_operands = 2 : i64, tpu.core_type = #tpu.core_type<tc>, window_params = [{transform_indices = @transform_0, window_bounds = array<i64: 32, 256>}, {transform_indices = @transform_1, window_bounds = array<i64: 1, 256>}, {pipeline_mode = #tpu.pipeline_mode<synchronous>, transform_indices = @transform_2, window_bounds = array<i64: 48, 32>}, {pipeline_mode = #tpu.pipeline_mode<synchronous>, transform_indices = @transform_3, window_bounds = array<i64: 48, 1>}, {pipeline_mode = #tpu.pipeline_mode<synchronous>, transform_indices = @transform_4, window_bounds = array<i64: 16, 32>}, {pipeline_mode = #tpu.pipeline_mode<synchronous>, transform_indices = @transform_5, window_bounds = array<i64: 1, 32>}, {transform_indices = @transform_6, window_bounds = array<i64: 32, 256>}]} {
    %c0 = arith.constant 0 : index
    %c0_0 = arith.constant 0 : index
    %0 = vector.load %arg1[%c0, %c0_0] : memref<32x256xf32, #tpu.memory_space<vmem>>, vector<32x256xf32>
    %1 = arith.truncf %0 : vector<32x256xf32> to vector<32x256xbf16>
    %c0_1 = arith.constant 0 : index
    %c0_2 = arith.constant 0 : index
    %2 = vector.load %arg3[%c0_1, %c0_2] : memref<48x32xbf16, #tpu.memory_space<vmem>>, vector<48x32xbf16>
    %cst = arith.constant dense<0.000000e+00> : vector<48x256xf32>
    %3 = tpu.matmul %2, %1, %cst {dimension_numbers = #tpu.dot_dimension_numbers<[1], [0], [0], [1], [0, 0, 1, 1], [], []>} : vector<48x32xbf16>, vector<32x256xbf16>, vector<48x256xf32> -> vector<48x256xf32>
    %c0_3 = arith.constant 0 : index
    %c0_4 = arith.constant 0 : index
    %4 = vector.load %arg4[%c0_3, %c0_4] : memref<48x1xf32, #tpu.memory_space<vmem>>, vector<48x1xf32>
    %5 = vector.broadcast %4 : vector<48x1xf32> to vector<48x256xf32>
    %6 = arith.addf %3, %5 : vector<48x256xf32>
    %c0_5 = arith.constant 0 : index
    %c0_6 = arith.constant 0 : index
    %7 = vector.load %arg8[%c0_5, %c0_6] : memref<48x256xf32, #tpu.memory_space<vmem>>, vector<48x256xf32>
    tpu.vector_store %arg8[%c0_5, %c0_6], %6 {strides = array<i32>} : memref<48x256xf32, #tpu.memory_space<vmem>>, vector<48x256xf32>,
    %c0_i32 = arith.constant 0 : i32
    %c128_i32 = arith.constant 128 : i32
    %8 = arith.muli %c0_i32, %c128_i32 : i32
    %9 = tpu.assume_multiple %8, 128 : i32
    %c0_7 = arith.constant 0 : index
    %10 = arith.index_cast %9 : i32 to index
    %11 = vector.load %arg8[%c0_7, %10] : memref<48x256xf32, #tpu.memory_space<vmem>>, vector<16x128xf32>
    %c16 = arith.constant 16 : index
    %12 = arith.index_cast %9 : i32 to index
    %13 = vector.load %arg8[%c16, %12] : memref<48x256xf32, #tpu.memory_space<vmem>>, vector<16x128xf32>
    %c32 = arith.constant 32 : index
    %14 = arith.index_cast %9 : i32 to index
    %15 = vector.load %arg8[%c32, %14] : memref<48x256xf32, #tpu.memory_space<vmem>>, vector<16x128xf32>
    %c0_8 = arith.constant 0 : index
    %16 = arith.index_cast %9 : i32 to index
    %17 = vector.load %arg2[%c0_8, %16] : memref<1x256xf32, #tpu.memory_space<vmem>>, vector<1x128xf32>
    %18 = tpu.transpose %11, [1, 0] : vector<16x128xf32> -> vector<128x16xf32>
    %19 = arith.truncf %18 : vector<128x16xf32> to vector<128x16xbf16>
    %20 = arith.truncf %13 : vector<16x128xf32> to vector<16x128xbf16>
    %cst_9 = arith.constant dense<0.000000e+00> : vector<128x128xf32>
    %21 = tpu.matmul %19, %20, %cst_9 {dimension_numbers = #tpu.dot_dimension_numbers<[1], [0], [0], [1], [0, 0, 1, 1], [], []>} : vector<128x16xbf16>, vector<16x128xbf16>, vector<128x128xf32> -> vector<128x128xf32>
    %cst_10 = arith.constant 9.99999997E-7 : f32
    %22 = vector.broadcast %cst_10 : f32 to vector<1x128xf32>
    %23 = arith.addf %17, %22 : vector<1x128xf32>
    %24 = math.log %23 : vector<1x128xf32>
    %25 = vector.broadcast %24 : vector<1x128xf32> to vector<128x128xf32>
    %26 = arith.addf %21, %25 : vector<128x128xf32>
    %cst_11 = arith.constant dense<0xFF800000> : vector<128xf32>
    %27 = vector.multi_reduction <maximumf>, %26, %cst_11 [1] : vector<128x128xf32> to vector<128xf32>
    %28 = vector.shape_cast %27 : vector<128xf32> to vector<128x1xf32>
    %29 = vector.broadcast %28 : vector<128x1xf32> to vector<128x128xf32>
    %30 = arith.subf %26, %29 : vector<128x128xf32>
    %31 = math.exp %30 : vector<128x128xf32>
    %cst_12 = arith.constant dense<0.000000e+00> : vector<128xf32>
    %32 = vector.multi_reduction <add>, %31, %cst_12 [1] : vector<128x128xf32> to vector<128xf32>
    %33 = vector.shape_cast %32 : vector<128xf32> to vector<128x1xf32>
    %34 = tpu.reciprocal %33 : vector<128x1xf32> -> vector<128x1xf32>
    %35 = vector.broadcast %34 : vector<128x1xf32> to vector<128x128xf32>
    %36 = arith.mulf %31, %35 : vector<128x128xf32>
    %37 = vector.broadcast %17 : vector<1x128xf32> to vector<128x128xf32>
    %38 = arith.mulf %36, %37 : vector<128x128xf32>
    %39 = tpu.transpose %15, [1, 0] : vector<16x128xf32> -> vector<128x16xf32>
    %40 = arith.truncf %39 : vector<128x16xf32> to vector<128x16xbf16>
    %41 = arith.truncf %38 : vector<128x128xf32> to vector<128x128xbf16>
    %cst_13 = arith.constant dense<0.000000e+00> : vector<128x16xf32>
    %42 = tpu.matmul %41, %40, %cst_13 {dimension_numbers = #tpu.dot_dimension_numbers<[1], [0], [0], [1], [0, 0, 1, 1], [], []>} : vector<128x128xbf16>, vector<128x16xbf16>, vector<128x16xf32> -> vector<128x16xf32>
    %cst_14 = arith.constant 0.000000e+00 : f32
    %43 = vector.broadcast %cst_14 : f32 to vector<128x16xf32>
    %44 = arith.maximumf %42, %43 : vector<128x16xf32>
    %45 = arith.truncf %44 : vector<128x16xf32> to vector<128x16xbf16>
    %46 = arith.index_cast %9 : i32 to index
    %c0_15 = arith.constant 0 : index
    %47 = vector.load %arg9[%46, %c0_15] : memref<256x16xbf16, #tpu.memory_space<vmem>>, vector<128x16xbf16>
    tpu.vector_store %arg9[%46, %c0_15], %45 {strides = array<i32>} : memref<256x16xbf16, #tpu.memory_space<vmem>>, vector<128x16xbf16>,
    %c1_i32 = arith.constant 1 : i32
    %c128_i32_16 = arith.constant 128 : i32
    %48 = arith.muli %c1_i32, %c128_i32_16 : i32
    %49 = tpu.assume_multiple %48, 128 : i32
    %c0_17 = arith.constant 0 : index
    %50 = arith.index_cast %49 : i32 to index
    %51 = vector.load %arg8[%c0_17, %50] : memref<48x256xf32, #tpu.memory_space<vmem>>, vector<16x128xf32>
    %c16_18 = arith.constant 16 : index
    %52 = arith.index_cast %49 : i32 to index
    %53 = vector.load %arg8[%c16_18, %52] : memref<48x256xf32, #tpu.memory_space<vmem>>, vector<16x128xf32>
    %c32_19 = arith.constant 32 : index
    %54 = arith.index_cast %49 : i32 to index
    %55 = vector.load %arg8[%c32_19, %54] : memref<48x256xf32, #tpu.memory_space<vmem>>, vector<16x128xf32>
    %c0_20 = arith.constant 0 : index
    %56 = arith.index_cast %49 : i32 to index
    %57 = vector.load %arg2[%c0_20, %56] : memref<1x256xf32, #tpu.memory_space<vmem>>, vector<1x128xf32>
    %58 = tpu.transpose %51, [1, 0] : vector<16x128xf32> -> vector<128x16xf32>
    %59 = arith.truncf %58 : vector<128x16xf32> to vector<128x16xbf16>
    %60 = arith.truncf %53 : vector<16x128xf32> to vector<16x128xbf16>
    %cst_21 = arith.constant dense<0.000000e+00> : vector<128x128xf32>
    %61 = tpu.matmul %59, %60, %cst_21 {dimension_numbers = #tpu.dot_dimension_numbers<[1], [0], [0], [1], [0, 0, 1, 1], [], []>} : vector<128x16xbf16>, vector<16x128xbf16>, vector<128x128xf32> -> vector<128x128xf32>
    %cst_22 = arith.constant 9.99999997E-7 : f32
    %62 = vector.broadcast %cst_22 : f32 to vector<1x128xf32>
    %63 = arith.addf %57, %62 : vector<1x128xf32>
    %64 = math.log %63 : vector<1x128xf32>
    %65 = vector.broadcast %64 : vector<1x128xf32> to vector<128x128xf32>
    %66 = arith.addf %61, %65 : vector<128x128xf32>
    %cst_23 = arith.constant dense<0xFF800000> : vector<128xf32>
    %67 = vector.multi_reduction <maximumf>, %66, %cst_23 [1] : vector<128x128xf32> to vector<128xf32>
    %68 = vector.shape_cast %67 : vector<128xf32> to vector<128x1xf32>
    %69 = vector.broadcast %68 : vector<128x1xf32> to vector<128x128xf32>
    %70 = arith.subf %66, %69 : vector<128x128xf32>
    %71 = math.exp %70 : vector<128x128xf32>
    %cst_24 = arith.constant dense<0.000000e+00> : vector<128xf32>
    %72 = vector.multi_reduction <add>, %71, %cst_24 [1] : vector<128x128xf32> to vector<128xf32>
    %73 = vector.shape_cast %72 : vector<128xf32> to vector<128x1xf32>
    %74 = tpu.reciprocal %73 : vector<128x1xf32> -> vector<128x1xf32>
    %75 = vector.broadcast %74 : vector<128x1xf32> to vector<128x128xf32>
    %76 = arith.mulf %71, %75 : vector<128x128xf32>
    %77 = vector.broadcast %57 : vector<1x128xf32> to vector<128x128xf32>
    %78 = arith.mulf %76, %77 : vector<128x128xf32>
    %79 = tpu.transpose %55, [1, 0] : vector<16x128xf32> -> vector<128x16xf32>
    %80 = arith.truncf %79 : vector<128x16xf32> to vector<128x16xbf16>
    %81 = arith.truncf %78 : vector<128x128xf32> to vector<128x128xbf16>
    %cst_25 = arith.constant dense<0.000000e+00> : vector<128x16xf32>
    %82 = tpu.matmul %81, %80, %cst_25 {dimension_numbers = #tpu.dot_dimension_numbers<[1], [0], [0], [1], [0, 0, 1, 1], [], []>} : vector<128x128xbf16>, vector<128x16xbf16>, vector<128x16xf32> -> vector<128x16xf32>
    %cst_26 = arith.constant 0.000000e+00 : f32
    %83 = vector.broadcast %cst_26 : f32 to vector<128x16xf32>
    %84 = arith.maximumf %82, %83 : vector<128x16xf32>
    %85 = arith.truncf %84 : vector<128x16xf32> to vector<128x16xbf16>
    %86 = arith.index_cast %49 : i32 to index
    %c0_27 = arith.constant 0 : index
    %87 = vector.load %arg9[%86, %c0_27] : memref<256x16xbf16, #tpu.memory_space<vmem>>, vector<128x16xbf16>
    tpu.vector_store %arg9[%86, %c0_27], %85 {strides = array<i32>} : memref<256x16xbf16, #tpu.memory_space<vmem>>, vector<128x16xbf16>,
    %c2_i32 = arith.constant 2 : i32
    %c0_28 = arith.constant 0 : index
    %c0_29 = arith.constant 0 : index
    %88 = vector.load %arg9[%c0_28, %c0_29] : memref<256x16xbf16, #tpu.memory_space<vmem>>, vector<256x16xbf16>
    %c0_30 = arith.constant 0 : index
    %c0_31 = arith.constant 0 : index
    %89 = vector.load %arg5[%c0_30, %c0_31] : memref<16x32xbf16, #tpu.memory_space<vmem>>, vector<16x32xbf16>
    %cst_32 = arith.constant dense<0.000000e+00> : vector<256x32xf32>
    %90 = tpu.matmul %88, %89, %cst_32 {dimension_numbers = #tpu.dot_dimension_numbers<[1], [0], [0], [1], [0, 0, 1, 1], [], []>} : vector<256x16xbf16>, vector<16x32xbf16>, vector<256x32xf32> -> vector<256x32xf32>
    %c0_33 = arith.constant 0 : index
    %c0_34 = arith.constant 0 : index
    %91 = vector.load %arg6[%c0_33, %c0_34] : memref<1x32xf32, #tpu.memory_space<vmem>>, vector<1x32xf32>
    %92 = vector.broadcast %91 : vector<1x32xf32> to vector<256x32xf32>
    %93 = arith.addf %90, %92 : vector<256x32xf32>
    %94 = tpu.transpose %93, [1, 0] : vector<256x32xf32> -> vector<32x256xf32>
    %c0_35 = arith.constant 0 : index
    %c0_36 = arith.constant 0 : index
    %95 = vector.load %arg2[%c0_35, %c0_36] : memref<1x256xf32, #tpu.memory_space<vmem>>, vector<1x256xf32>
    %96 = vector.broadcast %95 : vector<1x256xf32> to vector<32x256xf32>
    %97 = arith.mulf %94, %96 : vector<32x256xf32>
    %c0_37 = arith.constant 0 : index
    %c0_38 = arith.constant 0 : index
    %98 = vector.load %arg7[%c0_37, %c0_38] : memref<32x256xf32, #tpu.memory_space<vmem>>, vector<32x256xf32>
    tpu.vector_store %arg7[%c0_37, %c0_38], %97 {strides = array<i32>} : memref<32x256xf32, #tpu.memory_space<vmem>>, vector<32x256xf32>,
    return
  }
  func.func @transform_0(%arg0: i32) -> (i32, i32) {
    %c0_i32 = arith.constant 0 : i32
    %c0_i32_0 = arith.constant 0 : i32
    return %c0_i32, %arg0 : i32, i32
  }
  func.func @transform_1(%arg0: i32) -> (i32, i32) {
    %c0_i32 = arith.constant 0 : i32
    %c0_i32_0 = arith.constant 0 : i32
    return %c0_i32, %arg0 : i32, i32
  }
  func.func @transform_2(%arg0: i32) -> (i32, i32) {
    %c0_i32 = arith.constant 0 : i32
    %c0_i32_0 = arith.constant 0 : i32
    %c0_i32_1 = arith.constant 0 : i32
    return %c0_i32, %c0_i32_0 : i32, i32
  }
  func.func @transform_3(%arg0: i32) -> (i32, i32) {
    %c0_i32 = arith.constant 0 : i32
    %c0_i32_0 = arith.constant 0 : i32
    %c0_i32_1 = arith.constant 0 : i32
    return %c0_i32, %c0_i32_0 : i32, i32
  }
  func.func @transform_4(%arg0: i32) -> (i32, i32) {
    %c0_i32 = arith.constant 0 : i32
    %c0_i32_0 = arith.constant 0 : i32
    %c0_i32_1 = arith.constant 0 : i32
    return %c0_i32, %c0_i32_0 : i32, i32
  }
  func.func @transform_5(%arg0: i32) -> (i32, i32) {
    %c0_i32 = arith.constant 0 : i32
    %c0_i32_0 = arith.constant 0 : i32
    %c0_i32_1 = arith.constant 0 : i32
    return %c0_i32, %c0_i32_0 : i32, i32
  }
  func.func @transform_6(%arg0: i32) -> (i32, i32) {
    %c0_i32 = arith.constant 0 : i32
    %c0_i32_0 = arith.constant 0 : i32
    return %c0_i32, %arg0 : i32, i32
  }
}

</mosaic_0001>

<bundles_post_ra>
// kernel: tpu_custom_call.1
= control target key start
LH: loop header
LB: loop body
LE: loop exit
PB: predicated region body
PF: predicated region fallthrough
CT: control target
= control target key end

     0   :  { %11 = vsyncpa [#allocation5], 0  ;;  %s3337_s0 = inlined_call_operand.hbm [shape: f32[32,512], index: 0, kind: input, shape index: {}]   ;;  %s3338_s1 = inlined_call_operand.vmem [shape: f32[1,512], index: 1, kind: input, shape index: {}]   ;;  %s3339_s2 = inlined_call_operand.vmem [shape: bf16[48,32], index: 2, kind: input, shape index: {}]   ;;  %s3340_s3 = inlined_call_operand.vmem [shape: f32[48,1], index: 3, kind: input, shape index: {}]   ;;  %s3341_s4 = inlined_call_operand.vmem [shape: bf16[16,32], index: 4, kind: input, shape index: {}]   ;;  %s3342_s5 = inlined_call_operand.vmem [shape: f32[1,32], index: 5, kind: input, shape index: {}]   ;;  %s3343_s6 = inlined_call_operand.hbm [shape: f32[32,512], index: 6, kind: output, shape index: {}]  }
   0x1   :  { %13 = vsyncpa [#allocation5 + $0x1], 0 }
   0x2   :  { %14 = vsyncpa [#allocation6], 0 }
   0x3   :  { %16 = vsyncpa [#allocation6 + $0x1], 0  ;;  %s2599_s21 = smov 0   ;;  %s2601_s22 = smov 0  }
   0x4   :  { %s2603_s23 = smov 0   ;;  %s2605_s24 = smov 0  }
   0x5 LB: > { %s2620_s25 = sadd.s32 4294967295, %s2553_s24   ;;  %s1920_s26 = sadd.s32 4294967294, %s2553_s24   ;;  %s2553_s24 = sphi %s2605_s24, %s3358_s24   ;;  %s2549_s23 = sphi %s2603_s23, %s3357_s23   ;;  %s2545_s22 = sphi %s2601_s22, %s3356_s22   ;;  %s2541_s21 = sphi %s2599_s21, %s3355_s21  }
   0x6   : > { %s2624_s27 = sadd.s32 1, %s2553_s24   ;;  %s29_s28 = sadd.s32 1, %s2549_s23 }
   0x7   : > { %s26_s29 = ssub.s32 %s2553_s24, %s2624_s27  ;;  %p36_p0 = scmp.ne.s32.totalorder %s2549_s23, %s2545_s22 }
   0x8   : > { %p27_p1 = scmp.eq.s32.totalorder %s26_s29, 0  ;;  %p37_p2 = scmp.eq.s32.totalorder %s2553_s24, 0 }
   0x9   : > { %p42_p3 = scmp.ne.s32.totalorder %s2545_s22, %s2541_s21  ;;  %p43_p4 = scmp.eq.s32.totalorder %s2620_s25, 0 }
   0xa   : > { %s2636_s30 = scalar_select %p27_p1, %s2549_s23, %s29_s28  }
   0xb   : > { %p2638_p5 = por %p37_p2, %p36_p0  ;;  %p2642_p6 = por %p43_p4, %p42_p3 }
   0xc   : > { %p176_p7 = scmp.eq.s32.totalorder %s2620_s25, 1  ;;  %p182_p8 = scmp.eq.s32.totalorder %s1920_s26, 1 }
   0xd   : > { %p2193_p10 = scmp.lt.s32.totalorder %s2553_s24, 2  ;;  %s214_s11 = sand.u32 1, %s2549_s23  }
   0xe   : > { %p2649_p11 = por %p176_p7, %p36_p0  ;;  %p2653_p12 = por %p182_p8, %p42_p3 }
   0xf   : > { %s1976_s12 = sshll.u32 %s2553_s24, 8  ;;  %s1923_s13 = sshll.u32 %s214_s11, 6 }
  0x10   : > { %s3347_s9 = scalar_select %p2649_p11, 1, 0 }
  0x11   : > { %s3348_s10 = scalar_select %p2653_p12, 1, 0 }
  0x12   : > { %s2662_s16 = scalar_lea.hbm %s3337_s0, %s1976_s12  ;;  %s218_s17 = scalar_lea.vmem [#allocation4], %s1923_s13 }
  0x13   : > { %s225_s18 = sshll.u32 %s218_s17, 4  ;;  %p2666_p13 = pnand %p2193_p10, %p2638_p5  ;;  %s2670_s18 = int_to_ptr.vmem [resolvable:$true] %s225_s18 }
  0x14   : > { %s2673_s20 = scalar_lea.sflag [#allocation5], %s214_s11  ;;  %s2457_s26 = scalar_lea.hbm %s2662_s16, 1024 }
  0x15   : > { %p2458_p1 = scmp.ne.s32.totalorder %s2662_s16, %s2457_s26  ;;  %p2459_p2 = pneg %p2666_p13 }
  0x16   : > { %s2462_s7 = scalar_lea.hbm %s3337_s0, 2048  ;;  %p2463_p5 = scmp.lt.u32.totalorder %s2662_s16, %s3337_s0 }
  0x17   : > { %p2460_p3 = pnand %p2459_p2, %p2458_p1  ;;  %p2464_p7 = scmp.lt.u32.totalorder %s2462_s7, %s2457_s26 }
  0x18   : > { %p2466_p10 = scmp.lt.u32.totalorder %s2457_s26, %s2662_s16 }
  0x19   : > { %p2461_p4 = pneg %p2460_p3  ;;  %p2465_p8 = por %p2464_p7, %p2463_p5 }
  0x1b   : > { %p2467_p9 = por %p2466_p10, %p2465_p8 }
  0x1d   : > { %p2468_p0 = pnand %p2467_p9, %p2461_p4 }
  0x1f   : > { %2471 = shalt.err (!%p2468_p0)
}
  0x20   : > { %s2472_s11 = scalar_lea.vmem %s2670_s18, 1024  ;;  %s2555_s14 = smov [#allocation4]  }
  0x21   : > { %p2473_p1 = scmp.ne.s32.totalorder %s2670_s18, %s2472_s11  ;;  %s2477_s15 = sshll.u32 %s2555_s14, 4  ;;  %s2478_s15 = int_to_ptr.vmem [resolvable:$false] %s2477_s15 }
  0x22   : > { %s2479_s17 = scalar_lea.vmem %s2478_s15, 2048  ;;  %p2480_p11 = scmp.lt.s32.totalorder %s2670_s18, %s2478_s15 }
  0x23   : > { %p2475_p3 = pnand %p2473_p1, %p2459_p2  ;;  %p2481_p5 = scmp.lt.s32.totalorder %s2479_s17, %s2472_s11 }
  0x25   : > { %p2476_p12 = pneg %p2475_p3  ;;  %p2482_p7 = por %p2481_p5, %p2480_p11 }
  0x27   : > { %p2483_p8 = pnand %p2482_p7, %p2476_p12 }
  0x29   : > { %2486 = shalt.err (!%p2483_p8)
}
  0x2a   : > { %s2556_s26 = smov 512   ;;  %s2557_s28 = smov 256  }
  0x2b   : > { %s2558_s29 = smov 16   ;;  %p241_p9 = scmp.lt.s32.totalorder %s2553_s24, 3 }
  0x2c   : > { %2188 = dma.hbm_to_vmem [thread:$0]  (!%p2666_p13), %s2662_s16, 1024, %s2670_s18, %s2673_s20, %s2556_s26, %s2557_s28, %s2558_s29  }
  0x2d   : > { %p3350_p0 = scmp.ge.s32.totalorder %s2553_s24, 1 }
  0x2f   : > { %p242_p2 = pnand %p3350_p0, %p241_p9 }
  0x30   : > { %s2705_s7 = sand.u32 (!%p242_p2), 1, %s2545_s22  }
  0x31   : > { %245 = sbr.rel (%p242_p2) target bundleno = 1714 (0x6b2), region = 44  ;;  %s1927_s12 = sshll.u32 (!%p242_p2), %s2705_s7, 6 }
  0x32   : > { %s248_s13 = scalar_lea.sflag (!%p242_p2), [#allocation5], %s2705_s7  ;;  %s251_s11 = scalar_lea.vmem (!%p242_p2), [#allocation4], %s1927_s12 }
  0x38   : > { %2532 = dma.done.wait (%p2642_p6), %s248_s13, 1024  }
  0x39   : > { %2534 = vsyncadd (%p2642_p6), %s248_s13, 4294966272  ;;  %v2559_v0 = vmov 0   ;;  %v293_v1 = vld [vmem:[%s251_s11 + $0x8] sm:$0xff]  ;;  %v295_v2 = vld [vmem:[%s251_s11 + $0x18] sm:$0xff]  ;;  %vm361_vm0 = vcmask 261120   ;;  %vm503_vm1 = vcmask 130048  }
  0x3a   : > { %403 = vmatprep.mubr.bf16.mxu0 %v2559_v0  ;;  %2235 = vset.pattern.permute.xlu0 %v2559_v0  ;;  %v292_v3 = vld [vmem:[%s251_s11] sm:$0xff]  ;;  %v301_v4 = vpack.c.bf16 %v295_v2, %v293_v1  ;;  %v294_v5 = vld [vmem:[%s251_s11 + $0x10] sm:$0xff]  ;;  %v297_v6 = vld [vmem:[%s251_s11 + $0x28] sm:$0xff]  ;;  %s1929_s14 = sshll.u32 %s2620_s25, 1  ;;  %s283_s16 = scalar_lea.vmem [#allocation7], %s1927_s12 }
  0x3b   : > { %2236 = vset.pattern.permute.xlu1 %v2559_v0  ;;  %v299_v7 = vld [vmem:[%s251_s11 + $0x38] sm:$0xff]  ;;  %v300_v8 = vpack.c.bf16 %v294_v5, %v292_v3  ;;  %v296_v10 = vld [vmem:[%s251_s11 + $0x20] sm:$0xff]  ;;  %v298_v11 = vld [vmem:[%s251_s11 + $0x30] sm:$0xff]  ;;  %p286_p6 = scmp.lt.s32.totalorder %s1929_s14, 3  ;;  %s1838_s12 = sshll.u32 %s283_s16, 4  ;;  %s3288_s12 = int_to_ptr.vmem [resolvable:$true] %s1838_s12 }
  0x3c   : > { %v303_v9 = vpack.c.bf16 %v299_v7, %v297_v6  ;;  %371 = vmatprep.subr.bf16.mxu0 %v301_v4  ;;  %v310_v12 = vld [vmem:[%s3340_s3] sm:$0xff]  ;;  %v302_v13 = vpack.c.bf16 %v298_v11, %v296_v10  ;;  %v311_v14 = vld [vmem:[%s3340_s3 + $0x8] sm:$0xff]  ;;  %v312_v15 = vld [vmem:[%s3340_s3 + $0x10] sm:$0xff]  ;;  %s1977_s18 = sshll.u32 %s2620_s25, 8  ;;  %s2487_s15 = scalar_lea.vmem %s3288_s12, 1024 }
  0x3d   : > { %372 = vmatpush1.bf16.msra.mxu0 %v300_v8  ;;  %318 = vperm.xlu0 %2235, %v310_v12   ;;  %v2321_v16 = vld [vmem:[%s3339_s2] sm:$0xff]   ;;  %v313_v17 = vld [vmem:[%s3340_s3 + $0x18] sm:$0xff]  ;;  %v2322_v18 = vld [vmem:[%s3339_s2 + $0x8] sm:$0xff]   ;;  %s3360_s14 = smov (!%p286_p6, %s1929_s14), 3  ;;  %s3293_s20 = scalar_lea.hbm %s3343_s6, %s1977_s18 }
  0x3e   : > { %373 = vmatprep.subr.bf16.mxu0 %v303_v9  ;;  %328 = vperm.xlu1 %2236, %v312_v15   ;;  %v2323_v19 = vld [vmem:[%s3339_s2 + $0x10] sm:$0xff]   ;;  %v314_v42 = vld [vmem:[%s3340_s3 + $0x20] sm:$0xff]  ;;  %v315_v47 = vld [vmem:[%s3340_s3 + $0x28] sm:$0xff]  ;;  %s2786_s26 = scalar_lea.vmem %s3338_s1, %s3360_s14  ;;  %s1825_s14 = scalar_lea.sflag [#allocation6], %s2705_s7 }
  0x3f   : > { %p2488_p11 = scmp.ne.s32.totalorder %s3288_s12, %s2487_s15  ;;  %p3352_p12 = scmp.ne.s32.totalorder %s3347_s9, 0 }
  0x40   : > { %s2560_s25 = smov [#allocation7]  }
  0x41   : > { %374 = vmatpush1.bf16.msra.mxu0 %v302_v13  ;;  %323 = vperm.xlu0 %2235, %v311_v14   ;;  %p2489_p13 = pnand %p2488_p11, %p3352_p12  ;;  %s2491_s17 = sshll.u32 %s2560_s25, 4  ;;  %s2492_s17 = int_to_ptr.vmem [resolvable:$false] %s2491_s17 }
  0x42   : > { %333 = vperm.xlu1 %2236, %v313_v17   ;;  %p2494_p10 = scmp.lt.s32.totalorder %s3288_s12, %s2492_s17 }
  0x43   : > { %p2490_p4 = pneg %p2489_p13 }
  0x44   : > { %1933 = vmatmul.mubr.msk.bf16.vlgmr.msra.gmra.mrb[0].mxu0 %vm361_vm0, %v2321_v16 }
  0x45   : > { %413 = vmatprep.mubr.bf16.mxu0 %v2559_v0 }
  0x4c   : > { %1934 = vmatmul.mubr.msk.bf16.gmra.mrb[4].mxu0 %vm361_vm0, %v2322_v18 }
  0x4d   : > { %423 = vmatprep.mubr.bf16.mxu0 %v2559_v0 }
  0x54   : > { %1935 = vmatmul.mubr.msk.bf16.gmra.mrb[8].mxu0 %vm361_vm0, %v2323_v19 }
  0xbc   : > { %v319_v20 = vpop.permute.xlu0 %318 }
  0xbd   : > { %v329_v26 = vpop.permute.xlu1 %328 }
  0xc0   : > { %v324_v28 = vpop.permute.xlu0 %323 }
  0xc1   : > { %v334_v32 = vpop.permute.xlu1 %333 }
 0x117   : > { %v405_v21 = vpop.f32.mrb[0].mxu0 }
 0x118   : > { %v406_v22 = vadd.f32 %v405_v21, %v319_v20  ;;  %v407_v23 = vpop.f32.mrb[1].mxu0 }
 0x119   : > { %v408_v24 = vadd.f32 %v407_v23, %v319_v20  ;;  %v409_v25 = vpop.f32.mrb[2].mxu0 }
 0x11a   : > { %v411_v27 = vpop.f32.mrb[3].mxu0  ;;  %453 = vxpose.xlu0.b32.start [1/2] (short) %v406_v22, 128  ;;  %v410_v29 = vadd.f32 %v409_v25, %v324_v28 }
 0x11b   : > { %977 = vxpose.xlu1.b32.start [1/2] (short) %v408_v24, 128  ;;  %v412_v30 = vadd.f32 %v411_v27, %v324_v28 }
 0x11e   : > { %454 = vxpose.xlu0.b32.end [2/2] (short) %v410_v29, 128 }
 0x11f   : > { %978 = vxpose.xlu1.b32.end [2/2] (short) %v412_v30, 128  ;;  %v415_v31 = vpop.f32.mrb[4].mxu0 }
 0x120   : > { %v416_v33 = vadd.f32 %v415_v31, %v329_v26  ;;  %v417_v34 = vpop.f32.mrb[5].mxu0 }
 0x121   : > { %v418_v35 = vadd.f32 %v417_v34, %v329_v26  ;;  %v419_v36 = vpop.f32.mrb[6].mxu0 }
 0x122   : > { %v420_v37 = vadd.f32 %v419_v36, %v334_v32  ;;  %v421_v38 = vpop.f32.mrb[7].mxu0 }
 0x123   : > { %v422_v39 = vadd.f32 %v421_v38, %v334_v32 }
 0x124   : > { %v493_v40 = vpack.c.bf16 %v420_v37, %v416_v33 }
 0x125   : > { %v1017_v41 = vpack.c.bf16 %v422_v39, %v418_v35 }
 0x126   : > { %2045 = vmatprep.subr.bf16.mxu1 %v493_v40 }
 0x127   : > { %2095 = vmatprep.subr.bf16.mxu0 %v1017_v41  ;;  %2046 = vmatpush3.bf16.msra.mxu1 %v493_v40  ;;  %v2739_v43 = vpop.f32.mrb[8].mxu0  ;;  %v2789_v40 = vld [vmem:[%s2786_s26] sm:$0x1] }
 0x128   : > { %2096 = vmatpush3.bf16.msra.mxu0 %v1017_v41  ;;  %v2741_v44 = vpop.f32.mrb[9].mxu0  ;;  %v2792_v41 = vld [vmem:[%s2786_s26 + $0x1] sm:$0x1] }
 0x129   : > { %v2743_v45 = vpop.f32.mrb[10].mxu0 }
 0x12a   : > { %v2745_v46 = vpop.f32.mrb[11].mxu0 }
 0x175   : > { %338 = vperm.xlu1 %2236, %v314_v42   ;;  %v494_v42 = vadd.f32 1e-06, %v2789_v40 }
 0x177   : > { %2325 = vlog2.f32 %v494_v42 }
 0x17f   : > { %343 = vperm.xlu0 %2235, %v315_v47  }
 0x19a   : > { %v469_v48 = vpop.trf.xlu0 }
 0x19b   : > { %v993_v49 = vpop.trf.xlu1 }
 0x19e   : > { %v470_v50 = vpop.trf.xlu0 }
 0x19f   : > { %v994_v51 = vpop.trf.xlu1  ;;  %v485_v52 = vpack.c.bf16 %v470_v50, %v469_v48 }
 0x1a0   : > { %v1009_v53 = vpack.c.bf16 %v994_v51, %v993_v49 }
 0x1a1   : > { %2047 = vmatprep.mubr.msk.bf16.mxu1 %vm503_vm1, %v485_v52 }
 0x1a2   : > { %2097 = vmatprep.mubr.msk.bf16.mxu0 %vm503_vm1, %v1009_v53  ;;  %v471_v54 = vpop.trf.xlu0 }
 0x1a3   : > { %v995_v55 = vpop.trf.xlu1 }
 0x1a6   : > { %v472_v56 = vpop.trf.xlu0 }
 0x1a7   : > { %v486_v57 = vpack.c.bf16 %v472_v56, %v471_v54  ;;  %v996_v58 = vpop.trf.xlu1 }
 0x1a8   : > { %v1010_v59 = vpack.c.bf16 %v996_v58, %v995_v55 }
 0x1a9   : > { %2048 = vmatmul.mubr.msk.bf16.vlgmr.msra.gmra.mrb[0].mxu1 %vm503_vm1, %v486_v57 }
 0x1aa   : > { %2098 = vmatmul.mubr.msk.bf16.vlgmr.msra.gmra.mrb[12].mxu0 %vm503_vm1, %v1010_v59  ;;  %v473_v60 = vpop.trf.xlu0 }
 0x1ab   : > { %v997_v61 = vpop.trf.xlu1 }
 0x1ae   : > { %v474_v62 = vpop.trf.xlu0 }
 0x1af   : > { %v487_v63 = vpack.c.bf16 %v474_v62, %v473_v60  ;;  %v998_v0 = vpop.trf.xlu1 }
 0x1b0   : > { %v1011_v1 = vpack.c.bf16 %v998_v0, %v997_v61 }
 0x1b1   : > { %2051 = vmatprep.mubr.msk.bf16.mxu1 %vm503_vm1, %v487_v63 }
 0x1b2   : > { %v475_v2 = vpop.trf.xlu0  ;;  %2101 = vmatprep.mubr.msk.bf16.mxu0 %vm503_vm1, %v1011_v1 }
 0x1b3   : > { %v999_v3 = vpop.trf.xlu1 }
 0x1b6   : > { %v476_v4 = vpop.trf.xlu0 }
 0x1b7   : > { %v488_v5 = vpack.c.bf16 %v476_v4, %v475_v2  ;;  %v1000_v6 = vpop.trf.xlu1 }
 0x1b8   : > { %v1012_v7 = vpack.c.bf16 %v1000_v6, %v999_v3 }
 0x1b9   : > { %2052 = vmatmul.mubr.msk.bf16.gmra.mrb[4].mxu1 %vm503_vm1, %v488_v5 }
 0x1ba   : > { %2102 = vmatmul.mubr.msk.bf16.gmra.mrb[16].mxu0 %vm503_vm1, %v1012_v7  ;;  %v477_v8 = vpop.trf.xlu0 }
 0x1bb   : > { %v1001_v9 = vpop.trf.xlu1 }
 0x1be   : > { %v478_v10 = vpop.trf.xlu0 }
 0x1bf   : > { %v489_v11 = vpack.c.bf16 %v478_v10, %v477_v8  ;;  %v1002_v12 = vpop.trf.xlu1 }
 0x1c0   : > { %v1013_v13 = vpack.c.bf16 %v1002_v12, %v1001_v9 }
 0x1c1   : > { %2055 = vmatprep.mubr.msk.bf16.mxu1 %vm503_vm1, %v489_v11 }
 0x1c2   : > { %v479_v14 = vpop.trf.xlu0  ;;  %2105 = vmatprep.mubr.msk.bf16.mxu0 %vm503_vm1, %v1013_v13 }
 0x1c3   : > { %v1003_v15 = vpop.trf.xlu1 }
 0x1c6   : > { %v480_v16 = vpop.trf.xlu0 }
 0x1c7   : > { %v490_v17 = vpack.c.bf16 %v480_v16, %v479_v14  ;;  %v1004_v18 = vpop.trf.xlu1 }
 0x1c8   : > { %v1014_v19 = vpack.c.bf16 %v1004_v18, %v1003_v15 }
 0x1c9   : > { %2056 = vmatmul.mubr.msk.bf16.gmra.mrb[8].mxu1 %vm503_vm1, %v490_v17 }
 0x1ca   : > { %v481_v20 = vpop.trf.xlu0  ;;  %2106 = vmatmul.mubr.msk.bf16.gmra.mrb[20].mxu0 %vm503_vm1, %v1014_v19 }
 0x1cb   : > { %v1005_v21 = vpop.trf.xlu1 }
 0x1ce   : > { %v482_v22 = vpop.trf.xlu0 }
 0x1cf   : > { %v491_v23 = vpack.c.bf16 %v482_v22, %v481_v20  ;;  %v1006_v24 = vpop.trf.xlu1 }
 0x1d0   : > { %v1015_v25 = vpack.c.bf16 %v1006_v24, %v1005_v21 }
 0x1d1   : > { %2059 = vmatprep.mubr.msk.bf16.mxu1 %vm503_vm1, %v491_v23 }
 0x1d2   : > { %v483_v26 = vpop.trf.xlu0  ;;  %2109 = vmatprep.mubr.msk.bf16.mxu0 %vm503_vm1, %v1015_v25 }
 0x1d3   : > { %v1007_v27 = vpop.trf.xlu1 }
 0x1d6   : > { %v484_v28 = vpop.trf.xlu0 }
 0x1d7   : > { %v492_v29 = vpack.c.bf16 %v484_v28, %v483_v26  ;;  %v1008_v30 = vpop.trf.xlu1 }
 0x1d8   : > { %v1016_v31 = vpack.c.bf16 %v1008_v30, %v1007_v27 }
 0x1d9   : > { %2060 = vmatmul.mubr.msk.bf16.gmra.mrb[12].mxu1 %vm503_vm1, %v492_v29 }
 0x1da   : > { %2110 = vmatmul.mubr.msk.bf16.gmra.mrb[24].mxu0 %vm503_vm1, %v1016_v31 }
 0x1f4   : > { %v339_v32 = vpop.permute.xlu1 %338 }
 0x1f5   : > { %v2767_v33 = vadd.f32 %v2739_v43, %v339_v32  ;;  %v2770_v34 = vadd.f32 %v2741_v44, %v339_v32  ;;  %v1018_v43 = vadd.f32 1e-06, %v2792_v41  ;;  %v498_v44 = vlaneseq }
 0x1f7   : > { %v2237_v35 = vpack.i.bf16 %v2770_v34, %v2767_v33  ;;  %2327 = vlog2.f32 %v1018_v43 }
 0x1fe   : > { %v344_v36 = vpop.permute.xlu0 %343 }
 0x1ff   : > { %v2775_v37 = vadd.f32 %v2743_v45, %v344_v36  ;;  %v2778_v38 = vadd.f32 %v2745_v46, %v344_v36  ;;  %v2796_v45 = vshrl.u32 %v498_v44, 7  ;;  %v2326_v46 = vpop.eup %2325 }
 0x200   : > { %v496_v48 = vmul.f32 0.6931472, %v2326_v46 }
 0x201   : > { %v2239_v39 = vpack.i.bf16 %v2778_v38, %v2775_v37  ;;  %v2328_v47 = vpop.eup %2327  ;;  %v2799_v49 = vsub.s32 0, %v2796_v45 }
 0x202   : > { %v1020_v50 = vmul.f32 0.6931472, %v2328_v47 }
 0x203   : > { %v2802_v51 = vrot.slane %v496_v48, %v2799_v49 }
 0x204   : > { %v2805_v52 = vrot.slane %v1020_v50, %v2799_v49 }
 0x27c   : > { %v2049_v53 = vpop.f32.mrb[0].mxu1 }
 0x27d   : > { %v2808_v54 = vadd.f32 %v2049_v53, %v2802_v51  ;;  %v562_v55 = vpop.f32.mrb[1].mxu1  ;;  %v2099_v56 = vpop.f32.mrb[12].mxu0 }
 0x27e   : > { %v2811_v57 = vadd.f32 %v2099_v56, %v2805_v52  ;;  %v2050_v58 = vpop.f32.mrb[2].mxu1  ;;  %v1085_v59 = vpop.f32.mrb[13].mxu0  ;;  %v2816_v63 = vadd.f32 %v562_v55, %v2802_v51 }
 0x27f   : > { %v2100_v60 = vpop.f32.mrb[14].mxu0  ;;  %629 = vmax.xlane.f32.xlu0 %v2808_v54  ;;  %v565_v61 = vpop.f32.mrb[3].mxu1  ;;  %v2819_v0 = vadd.f32 %v1085_v59, %v2805_v52  ;;  %v2824_v1 = vadd.f32 %v2050_v58, %v2802_v51 }
 0x280   : > { %1152 = vmax.xlane.f32.xlu1 %v2811_v57  ;;  %v1088_v62 = vpop.f32.mrb[15].mxu0  ;;  %v2827_v2 = vadd.f32 %v565_v61, %v2802_v51  ;;  %v2832_v3 = vadd.f32 %v2100_v60, %v2805_v52 }
 0x281   : > { %v2836_v5 = vadd.f32 %v1088_v62, %v2805_v52 }
 0x283   : > { %625 = vmax.xlane.f32.xlu0 %v2816_v63 }
 0x284   : > { %1148 = vmax.xlane.f32.xlu1 %v2819_v0 }
 0x287   : > { %631 = vmax.xlane.f32.xlu0 %v2824_v1 }
 0x288   : > { %627 = vmax.xlane.f32.xlu1 %v2827_v2 }
 0x28b   : > { %1154 = vmax.xlane.f32.xlu0 %v2832_v3 }
 0x28c   : > { %v2053_v4 = vpop.f32.mrb[4].mxu1 }
 0x28d   : > { %v2839_v6 = vadd.f32 %v2053_v4, %v2802_v51  ;;  %v578_v7 = vpop.f32.mrb[5].mxu1  ;;  %v2103_v8 = vpop.f32.mrb[16].mxu0 }
 0x28e   : > { %v2054_v9 = vpop.f32.mrb[6].mxu1  ;;  %v1101_v10 = vpop.f32.mrb[17].mxu0  ;;  %v2844_v14 = vadd.f32 %v578_v7, %v2802_v51  ;;  %v2852_v16 = vadd.f32 %v2103_v8, %v2805_v52 }
 0x28f   : > { %v2104_v11 = vpop.f32.mrb[18].mxu0  ;;  %1150 = vmax.xlane.f32.xlu0 %v2836_v5  ;;  %637 = vmax.xlane.f32.xlu1 %v2839_v6  ;;  %v581_v12 = vpop.f32.mrb[7].mxu1  ;;  %v2847_v15 = vadd.f32 %v2054_v9, %v2802_v51  ;;  %v2860_v18 = vadd.f32 %v1101_v10, %v2805_v52 }
 0x290   : > { %v1104_v13 = vpop.f32.mrb[19].mxu0  ;;  %v2855_v17 = vadd.f32 %v581_v12, %v2802_v51  ;;  %v2918_v7 = vadd.f32 %v2104_v11, %v2805_v52 }
 0x291   : > { %v2863_v19 = vadd.f32 %v1104_v13, %v2805_v52 }
 0x293   : > { %639 = vmax.xlane.f32.xlu0 %v2847_v15  ;;  %633 = vmax.xlane.f32.xlu1 %v2844_v14 }
 0x297   : > { %635 = vmax.xlane.f32.xlu0 %v2855_v17  ;;  %1160 = vmax.xlane.f32.xlu1 %v2852_v16 }
 0x29b   : > { %1158 = vmax.xlane.f32.xlu0 %v2863_v19  ;;  %1156 = vmax.xlane.f32.xlu1 %v2860_v18 }
 0x29c   : > { %v2057_v20 = vpop.f32.mrb[8].mxu1 }
 0x29d   : > { %v2868_v21 = vadd.f32 %v2057_v20, %v2802_v51  ;;  %v594_v22 = vpop.f32.mrb[9].mxu1  ;;  %v2107_v23 = vpop.f32.mrb[20].mxu0 }
 0x29e   : > { %v2058_v24 = vpop.f32.mrb[10].mxu1  ;;  %v1117_v25 = vpop.f32.mrb[21].mxu0  ;;  %v2878_v31 = vadd.f32 %v594_v22, %v2802_v51  ;;  %v2921_v8 = vadd.f32 %v2107_v23, %v2805_v52 }
 0x29f   : > { %v2871_v26 = vadd.f32 %v2058_v24, %v2802_v51  ;;  %645 = vmax.xlane.f32.xlu1 %v2868_v21  ;;  %v597_v27 = vpop.f32.mrb[11].mxu1  ;;  %v2108_v28 = vpop.f32.mrb[22].mxu0  ;;  %v2914_v4 = vadd.f32 %v1117_v25, %v2805_v52 }
 0x2a0   : > { %v2875_v29 = vadd.f32 %v2108_v28, %v2805_v52  ;;  %v1120_v30 = vpop.f32.mrb[23].mxu0  ;;  %v2882_v32 = vadd.f32 %v597_v27, %v2802_v51 }
 0x2a1   : > { %647 = vmax.xlane.f32.xlu0 %v2871_v26 }
 0x2a3   : > { %641 = vmax.xlane.f32.xlu1 %v2878_v31 }
 0x2a5   : > { %643 = vmax.xlane.f32.xlu0 %v2882_v32 }
 0x2ac   : > { %v2061_v36 = vpop.f32.mrb[12].mxu1 }
 0x2ad   : > { %v2887_v42 = vadd.f32 %v2061_v36, %v2802_v51  ;;  %v610_v43 = vpop.f32.mrb[13].mxu1  ;;  %v2111_v44 = vpop.f32.mrb[24].mxu0 }
 0x2ae   : > { %v2062_v46 = vpop.f32.mrb[14].mxu1  ;;  %v2890_v47 = vadd.f32 %v2111_v44, %v2805_v52  ;;  %v1133_v48 = vpop.f32.mrb[25].mxu0  ;;  %v2893_v50 = vadd.f32 %v610_v43, %v2802_v51 }
 0x2af   : > { %v2896_v53 = vadd.f32 %v2062_v46, %v2802_v51  ;;  %653 = vmax.xlane.f32.xlu1 %v2887_v42  ;;  %v613_v55 = vpop.f32.mrb[15].mxu1  ;;  %v2900_v56 = vadd.f32 %v1133_v48, %v2805_v52  ;;  %v2112_v58 = vpop.f32.mrb[26].mxu0 }
 0x2b0   : > { %v2903_v59 = vadd.f32 %v2112_v58, %v2805_v52  ;;  %v1136_v60 = vpop.f32.mrb[27].mxu0  ;;  %v2907_v61 = vadd.f32 %v613_v55, %v2802_v51  ;;  %v2926_v51 = vadd.f32 %v1120_v30, %v2805_v52 }
 0x2b1   : > { %655 = vmax.xlane.f32.xlu0 %v2896_v53  ;;  %v2910_v62 = vadd.f32 %v1136_v60, %v2805_v52 }
 0x2b3   : > { %649 = vmax.xlane.f32.xlu1 %v2893_v50 }
 0x2b5   : > { %651 = vmax.xlane.f32.xlu0 %v2907_v61 }
 0x2b7   : > { %1164 = vmax.xlane.f32.xlu1 %v2914_v4 }
 0x2b9   : > { %1162 = vmax.xlane.f32.xlu0 %v2918_v7 }
 0x2bb   : > { %1168 = vmax.xlane.f32.xlu1 %v2921_v8 }
 0x2bd   : > { %1166 = vmax.xlane.f32.xlu0 %v2926_v51 }
 0x2bf   : > { %1172 = vmax.xlane.f32.xlu1 %v2900_v56 }
 0x2c1   : > { %1170 = vmax.xlane.f32.xlu0 %v2875_v29 }
 0x2c3   : > { %1176 = vmax.xlane.f32.xlu1 %v2890_v47 }
 0x2c5   : > { %1178 = vmax.xlane.f32.xlu0 %v2903_v59 }
 0x2c9   : > { %1174 = vmax.xlane.f32.xlu0 %v2910_v62 }
 0x30c   : > { %v630_v9 = vpop.xlane.xlu0 %629 }
 0x30d   : > { %v659_v10 = vsub.f32 %v2808_v54, %v630_v9  ;;  %v1153_v11 = vpop.xlane.xlu1 %1152 }
 0x30f   : > { %v677_v52 = vmul.f32 1.442695, %v659_v10 }
 0x310   : > { %v626_v12 = vpop.xlane.xlu0 %625 }
 0x311   : > { %2329 = vpow2.f32 %v677_v52  ;;  %v657_v13 = vsub.f32 %v2816_v63, %v626_v12  ;;  %v1149_v20 = vpop.xlane.xlu1 %1148 }
 0x313   : > { %v673_v22 = vmul.f32 1.442695, %v657_v13  ;;  %v1180_v13 = vsub.f32 %v2819_v0, %v1149_v20  ;;  %v1182_v0 = vsub.f32 %v2811_v57, %v1153_v11 }
 0x314   : > { %v632_v23 = vpop.xlane.xlu0 %631 }
 0x315   : > { %2331 = vpow2.f32 %v673_v22  ;;  %v660_v24 = vsub.f32 %v2824_v1, %v632_v23  ;;  %v628_v25 = vpop.xlane.xlu1 %627 }
 0x316   : > { %v658_v27 = vsub.f32 %v2827_v2, %v628_v25 }
 0x317   : > { %v679_v28 = vmul.f32 1.442695, %v660_v24 }
 0x318   : > { %v1155_v30 = vpop.xlane.xlu0 %1154  ;;  %v675_v36 = vmul.f32 1.442695, %v658_v27 }
 0x319   : > { %2333 = vpow2.f32 %v679_v28 }
 0x31a   : > { %2335 = vpow2.f32 %v675_v36 }
 0x31b   : > { %v2939_v54 = vpop.eup %2329 }
 0x31c   : > { %v638_v43 = vpop.xlane.xlu1 %637  ;;  %709 = vadd.xlane.f32.xlu1 %v2939_v54  ;;  %v1151_v44 = vpop.xlane.xlu0 %1150 }
 0x31d   : > { %v663_v63 = vsub.f32 %v2839_v6, %v638_v43  ;;  %v1181_v24 = vsub.f32 %v2836_v5, %v1151_v44  ;;  %v1200_v44 = vmul.f32 1.442695, %v1182_v0 }
 0x31f   : > { %v2943_v46 = vpop.eup %2331  ;;  %v685_v48 = vmul.f32 1.442695, %v663_v63  ;;  %v1198_v20 = vmul.f32 1.442695, %v1181_v24 }
 0x320   : > { %v634_v1 = vpop.xlane.xlu1 %633  ;;  %705 = vadd.xlane.f32.xlu1 %v2943_v46  ;;  %v640_v2 = vpop.xlane.xlu0 %639 }
 0x321   : > { %2337 = vpow2.f32 %v685_v48  ;;  %v661_v55 = vsub.f32 %v2844_v14, %v634_v1  ;;  %v664_v58 = vsub.f32 %v2847_v15, %v640_v2  ;;  %v1196_v15 = vmul.f32 1.442695, %v1180_v13 }
 0x323   : > { %v2948_v60 = vpop.eup %2333  ;;  %v681_v9 = vmul.f32 1.442695, %v661_v55  ;;  %v687_v10 = vmul.f32 1.442695, %v664_v58 }
 0x324   : > { %v2950_v52 = vpop.xlane.xlu1 %1160  ;;  %711 = vadd.xlane.f32.xlu0 %v2948_v60  ;;  %v636_v6 = vpop.xlane.xlu0 %635 }
 0x325   : > { %2339 = vpow2.f32 %v681_v9  ;;  %v662_v12 = vsub.f32 %v2855_v17, %v636_v6  ;;  %v2955_v22 = vpop.eup %2335 }
 0x326   : > { %2341 = vpow2.f32 %v687_v10 }
 0x327   : > { %v683_v14 = vmul.f32 1.442695, %v662_v12 }
 0x328   : > { %v1157_v23 = vpop.xlane.xlu1 %1156  ;;  %707 = vadd.xlane.f32.xlu0 %v2955_v22  ;;  %v1159_v48 = vpop.xlane.xlu0 %1158 }
 0x329   : > { %2343 = vpow2.f32 %v683_v14  ;;  %v1184_v2 = vsub.f32 %v2860_v18, %v1157_v23 }
 0x32a   : > { %2345 = vpow2.f32 %v1196_v15 }
 0x32b   : > { %v2959_v25 = vpop.eup %2337  ;;  %v1204_v58 = vmul.f32 1.442695, %v1184_v2 }
 0x32c   : > { %v646_v27 = vpop.xlane.xlu1 %645  ;;  %717 = vadd.xlane.f32.xlu1 %v2959_v25 }
 0x32d   : > { %v667_v17 = vsub.f32 %v2868_v21, %v646_v27  ;;  %v1183_v21 = vsub.f32 %v2832_v3, %v1155_v30  ;;  %v1185_v3 = vsub.f32 %v2863_v19, %v1159_v48 }
 0x32f   : > { %v2964_v28 = vpop.eup %2339  ;;  %v693_v36 = vmul.f32 1.442695, %v667_v17  ;;  %v1202_v1 = vmul.f32 1.442695, %v1183_v21  ;;  %v1206_v10 = vmul.f32 1.442695, %v1185_v3 }
 0x330   : > { %v2966_v43 = vpop.eup %2341  ;;  %v642_v63 = vpop.xlane.xlu1 %641  ;;  %713 = vadd.xlane.f32.xlu1 %v2964_v28 }
 0x331   : > { %2347 = vpow2.f32 %v693_v36  ;;  %v665_v5 = vsub.f32 %v2878_v31, %v642_v63  ;;  %719 = vadd.xlane.f32.xlu0 %v2966_v43  ;;  %v648_v31 = vpop.xlane.xlu0 %647 }
 0x332   : > { %2349 = vpow2.f32 %v1198_v20  ;;  %v668_v18 = vsub.f32 %v2871_v26, %v648_v31 }
 0x333   : > { %v689_v57 = vmul.f32 1.442695, %v665_v5  ;;  %v2972_v11 = vpop.eup %2343 }
 0x334   : > { %v2976_v55 = vpop.eup %2345  ;;  %v695_v14 = vmul.f32 1.442695, %v668_v18 }
 0x335   : > { %2351 = vpow2.f32 %v689_v57  ;;  %715 = vadd.xlane.f32.xlu0 %v2972_v11  ;;  %v644_v12 = vpop.xlane.xlu0 %643 }
 0x336   : > { %2353 = vpow2.f32 %v1200_v44  ;;  %v666_v23 = vsub.f32 %v2882_v32, %v644_v12 }
 0x337   : > { %2355 = vpow2.f32 %v1202_v1 }
 0x338   : > { %2357 = vpow2.f32 %v1204_v58  ;;  %v691_v26 = vmul.f32 1.442695, %v666_v23 }
 0x339   : > { %1228 = vadd.xlane.f32.xlu0 %v2976_v55  ;;  %2359 = vpow2.f32 %v1206_v10 }
 0x33a   : > { %2361 = vpow2.f32 %v695_v14 }
 0x33b   : > { %v2980_v30 = vpop.eup %2347  ;;  %2363 = vpow2.f32 %v691_v26 }
 0x33c   : > { %v2982_v9 = vpop.eup %2349  ;;  %725 = vadd.xlane.f32.xlu1 %v2980_v30  ;;  %v654_v19 = vpop.xlane.xlu1 %653 }
 0x33d   : > { %1230 = vadd.xlane.f32.xlu0 %v2982_v9  ;;  %v671_v24 = vsub.f32 %v2887_v42, %v654_v19 }
 0x33e   : > { %v656_v0 = vpop.xlane.xlu0 %655 }
 0x33f   : > { %v2987_v6 = vpop.eup %2351  ;;  %v701_v20 = vmul.f32 1.442695, %v671_v24  ;;  %v672_v32 = vsub.f32 %v2896_v53, %v656_v0 }
 0x340   : > { %v2989_v13 = vpop.eup %2353  ;;  %721 = vadd.xlane.f32.xlu1 %v2987_v6  ;;  %v650_v27 = vpop.xlane.xlu1 %649 }
 0x341   : > { %1232 = vadd.xlane.f32.xlu0 %v2989_v13  ;;  %v2994_v15 = vpop.eup %2355  ;;  %v669_v36 = vsub.f32 %v2893_v50, %v650_v27  ;;  %2365 = vpow2.f32 %v701_v20  ;;  %v703_v21 = vmul.f32 1.442695, %v672_v32  ;;  %v1186_v50 = vsub.f32 %v2852_v16, %v2950_v52 }
 0x342   : > { %v2998_v17 = vpop.eup %2357  ;;  %v652_v44 = vpop.xlane.xlu0 %651 }
 0x343   : > { %v3002_v63 = vpop.eup %2359  ;;  %v697_v5 = vmul.f32 1.442695, %v669_v36  ;;  %v670_v57 = vsub.f32 %v2907_v61, %v652_v44  ;;  %v1208_v58 = vmul.f32 1.442695, %v1186_v50 }
 0x344   : > { %v3006_v42 = vpop.eup %2361  ;;  %v1165_v31 = vpop.xlane.xlu1 %1164 }
 0x345   : > { %1234 = vadd.xlane.f32.xlu0 %v2994_v15  ;;  %2367 = vpow2.f32 %v697_v5  ;;  %v3010_v48 = vpop.eup %2363  ;;  %v699_v1 = vmul.f32 1.442695, %v670_v57  ;;  %v1188_v16 = vsub.f32 %v2914_v4, %v1165_v31 }
 0x346   : > { %2369 = vpow2.f32 %v703_v21  ;;  %v1163_v53 = vpop.xlane.xlu0 %1162 }
 0x347   : > { %2371 = vpow2.f32 %v699_v1  ;;  %v1187_v3 = vsub.f32 %v2918_v7, %v1163_v53  ;;  %v1212_v19 = vmul.f32 1.442695, %v1188_v16  ;;  %v3072_v16 = vrot.slane %v2789_v40, %v2799_v49 }
 0x348   : > { %2373 = vpow2.f32 %v1208_v58  ;;  %v3023_v18 = vpop.xlane.xlu1 %1168 }
 0x349   : > { %1236 = vadd.xlane.f32.xlu0 %v2998_v17  ;;  %v1210_v52 = vmul.f32 1.442695, %v1187_v3 }
 0x34a   : > { %v1167_v10 = vpop.xlane.xlu0 %1166 }
 0x34b   : > { %v3015_v2 = vpop.eup %2365  ;;  %2375 = vpow2.f32 %v1210_v52  ;;  %v1189_v14 = vsub.f32 %v2926_v51, %v1167_v10 }
 0x34c   : > { %v1173_v26 = vpop.xlane.xlu1 %1172  ;;  %2377 = vpow2.f32 %v1212_v19 }
 0x34d   : > { %1238 = vadd.xlane.f32.xlu0 %v3002_v63  ;;  %v1214_v24 = vmul.f32 1.442695, %v1189_v14  ;;  %v1192_v20 = vsub.f32 %v2900_v56, %v1173_v26 }
 0x34e   : > { %v1171_v7 = vpop.xlane.xlu0 %1170 }
 0x34f   : > { %v3019_v61 = vpop.eup %2367  ;;  %v1191_v4 = vsub.f32 %v2875_v29, %v1171_v7  ;;  %2379 = vpow2.f32 %v1214_v24  ;;  %v1220_v5 = vmul.f32 1.442695, %v1192_v20 }
 0x350   : > { %v3025_v12 = vpop.eup %2369  ;;  %v1177_v51 = vpop.xlane.xlu1 %1176 }
 0x351   : > { %727 = vadd.xlane.f32.xlu0 %v3006_v42  ;;  %v3029_v23 = vpop.eup %2371  ;;  %v1218_v36 = vmul.f32 1.442695, %v1191_v4  ;;  %v1194_v44 = vsub.f32 %v2890_v47, %v1177_v51 }
 0x352   : > { %v3033_v27 = vpop.eup %2373  ;;  %v1179_v0 = vpop.xlane.xlu0 %1178 }
 0x353   : > { %2381 = vpow2.f32 %v1218_v36  ;;  %v1224_v57 = vmul.f32 1.442695, %v1194_v44  ;;  %v1195_v47 = vsub.f32 %v2903_v59, %v1179_v0 }
 0x354   : > { %2383 = vpow2.f32 %v1220_v5 }
 0x355   : > { %723 = vadd.xlane.f32.xlu0 %v3010_v48  ;;  %v3037_v32 = vpop.eup %2375  ;;  %2385 = vpow2.f32 %v1224_v57 }
 0x356   : > { %v1175_v21 = vpop.xlane.xlu0 %1174  ;;  %v3041_v29 = vpop.eup %2377 }
 0x357   : > { %v1193_v50 = vsub.f32 %v2910_v62, %v1175_v21  ;;  %v1226_v62 = vmul.f32 1.442695, %v1195_v47 }
 0x359   : > { %733 = vadd.xlane.f32.xlu0 %v3015_v2  ;;  %v3048_v56 = vpop.eup %2379  ;;  %v1222_v1 = vmul.f32 1.442695, %v1193_v50 }
 0x35b   : > { %2387 = vpow2.f32 %v1222_v1 }
 0x35c   : > { %2389 = vpow2.f32 %v1226_v62 }
 0x35d   : > { %729 = vadd.xlane.f32.xlu0 %v3019_v61  ;;  %v3055_v53 = vpop.eup %2381 }
 0x35e   : > { %v3058_v33 = vpop.eup %2383 }
 0x35f   : > { %v3061_v34 = vpop.eup %2385 }
 0x361   : > { %735 = vadd.xlane.f32.xlu0 %v3025_v12 }
 0x365   : > { %731 = vadd.xlane.f32.xlu0 %v3029_v23 }
 0x369   : > { %1240 = vadd.xlane.f32.xlu0 %v3033_v27 }
 0x36d   : > { %1242 = vadd.xlane.f32.xlu0 %v3037_v32 }
 0x371   : > { %1244 = vadd.xlane.f32.xlu0 %v3041_v29 }
 0x373   : > { %2238 = vxpose.xlu1.b32.start [1/2] (short) %v2237_v35, 128  ;;  %v3064_v35 = vpop.eup %2387 }
 0x374   : > { %v3067_v37 = vpop.eup %2389 }
 0x375   : > { %1246 = vadd.xlane.f32.xlu0 %v3048_v56 }
 0x377   : > { %2240 = vxpose.xlu1.b32.end [2/2] (short) %v2239_v39, 128 }
 0x379   : > { %1250 = vadd.xlane.f32.xlu0 %v3055_v53 }
 0x37d   : > { %1252 = vadd.xlane.f32.xlu0 %v3058_v33 }
 0x381   : > { %1256 = vadd.xlane.f32.xlu0 %v3061_v34 }
 0x385   : > { %1254 = vadd.xlane.f32.xlu0 %v3064_v35 }
 0x389   : > { %1258 = vadd.xlane.f32.xlu0 %v3067_v37 }
 0x3a9   : > { %v710_v38 = vpop.xlane.xlu1 %709 }
 0x3aa   : > { %2391 = vrcp.f32 %v710_v38 }
 0x3ad   : > { %v706_v39 = vpop.xlane.xlu1 %705 }
 0x3ae   : > { %2393 = vrcp.f32 %v706_v39 }
 0x3b1   : > { %v712_v59 = vpop.xlane.xlu0 %711 }
 0x3b2   : > { %2395 = vrcp.f32 %v712_v59 }
 0x3b4   : > { %v2392_v58 = vpop.eup %2391 }
 0x3b5   : > { %v708_v31 = vpop.xlane.xlu0 %707  ;;  %v755_v52 = vmul.f32 %v2392_v58, %v2939_v54 }
 0x3b6   : > { %2397 = vrcp.f32 %v708_v31 }
 0x3b7   : > { %v3077_v24 = vmul.f32 %v3072_v16, %v755_v52 }
 0x3b8   : > { %v2394_v10 = vpop.eup %2393 }
 0x3b9   : > { %v718_v3 = vpop.xlane.xlu1 %717  ;;  %v753_v0 = vmul.f32 %v2394_v10, %v2943_v46  ;;  %v3114_v10 = vrot.slane %v2792_v41, %v2799_v49 }
 0x3ba   : > { %2399 = vrcp.f32 %v718_v3 }
 0x3bb   : > { %v775_v51 = vmul.f32 %v3072_v16, %v753_v0 }
 0x3bc   : > { %v2396_v19 = vpop.eup %2395 }
 0x3bd   : > { %v756_v14 = vmul.f32 %v2396_v19, %v2948_v60  ;;  %v714_v7 = vpop.xlane.xlu1 %713  ;;  %v1190_v60 = vsub.f32 %v2921_v8, %v3023_v18 }
 0x3be   : > { %2401 = vrcp.f32 %v714_v7  ;;  %v720_v26 = vpop.xlane.xlu0 %719 }
 0x3bf   : > { %v3080_v4 = vmul.f32 %v3072_v16, %v756_v14  ;;  %2403 = vrcp.f32 %v720_v26  ;;  %v1216_v57 = vmul.f32 1.442695, %v1190_v60 }
 0x3c0   : > { %v2398_v40 = vpop.eup %2397 }
 0x3c1   : > { %v754_v20 = vmul.f32 %v2398_v40, %v2955_v22  ;;  %v832_v54 = vpack.c.bf16 %v3080_v4, %v3077_v24 }
 0x3c2   : > { %v716_v36 = vpop.xlane.xlu0 %715 }
 0x3c3   : > { %2405 = vrcp.f32 %v716_v36  ;;  %v776_v5 = vmul.f32 %v3072_v16, %v754_v20 }
 0x3c4   : > { %v2400_v44 = vpop.eup %2399 }
 0x3c5   : > { %v831_v21 = vpack.c.bf16 %v776_v5, %v775_v51  ;;  %v759_v22 = vmul.f32 %v2400_v44, %v2959_v25 }
 0x3c6   : > { %v1229_v50 = vpop.xlane.xlu0 %1228 }
 0x3c7   : > { %2407 = vrcp.f32 %v1229_v50  ;;  %2079 = vmatprep.mubr.bf16.mxu1 %v831_v21  ;;  %v3094_v62 = vmul.f32 %v3072_v16, %v759_v22 }
 0x3c8   : > { %v2402_v46 = vpop.eup %2401  ;;  %2409 = vpow2.f32 %v1216_v57 }
 0x3c9   : > { %v2404_v47 = vpop.eup %2403  ;;  %v757_v18 = vmul.f32 %v2402_v46, %v2964_v28  ;;  %v3127_v41 = vpop.xlane.xlu1 %725 }
 0x3ca   : > { %v1231_v1 = vpop.xlane.xlu0 %1230  ;;  %v760_v8 = vmul.f32 %v2404_v47, %v2966_v43 }
 0x3cb   : > { %2411 = vrcp.f32 %v1231_v1  ;;  %v3103_v31 = vmul.f32 %v3072_v16, %v757_v18 }
 0x3cc   : > { %v3097_v38 = vmul.f32 %v3072_v16, %v760_v8 }
 0x3cd   : > { %v2406_v39 = vpop.eup %2405  ;;  %v3131_v60 = vpop.xlane.xlu1 %721 }
 0x3ce   : > { %v758_v59 = vmul.f32 %v2406_v39, %v2972_v11  ;;  %v3121_v26 = vpop.xlane.xlu0 %1232 }
 0x3cf   : > { %2413 = vrcp.f32 %v3121_v26 }
 0x3d0   : > { %v3106_v43 = vmul.f32 %v3072_v16, %v758_v59 }
 0x3d1   : > { %v2408_v58 = vpop.eup %2407 }
 0x3d2   : > { %v833_v28 = vpack.c.bf16 %v3106_v43, %v3103_v31  ;;  %v3110_v3 = vpop.eup %2409  ;;  %v1276_v11 = vmul.f32 %v2408_v58, %v2976_v55  ;;  %v3123_v40 = vpop.xlane.xlu0 %1234 }
 0x3d3   : > { %2415 = vrcp.f32 %v3123_v40 }
 0x3d4   : > { %v1298_v14 = vmul.f32 %v3114_v10, %v1276_v11 }
 0x3d5   : > { %v2412_v52 = vpop.eup %2411 }
 0x3d6   : > { %1248 = vadd.xlane.f32.xlu1 %v3110_v3  ;;  %v1277_v19 = vmul.f32 %v2412_v52, %v2982_v9  ;;  %v3125_v20 = vpop.xlane.xlu0 %1236 }
 0x3d8   : > { %v1299_v7 = vmul.f32 %v3114_v10, %v1277_v19 }
 0x3da   : > { %v1354_v0 = vpack.c.bf16 %v1299_v7, %v1298_v14  ;;  %v3129_v55 = vpop.xlane.xlu0 %1238 }
 0x3db   : > { %2417 = vrcp.f32 %v3129_v55  ;;  %v2414_v55 = vpop.eup %2413 }
 0x3dc   : > { %2129 = vmatprep.mubr.bf16.mxu0 %v1354_v0  ;;  %2419 = vrcp.f32 %v3125_v20 }
 0x3dd   : > { %2421 = vrcp.f32 %v3131_v60  ;;  %v2416_v20 = vpop.eup %2415 }
 0x3de   : > { %v3133_v36 = vpop.xlane.xlu0 %727 }
 0x3e2   : > { %v3135_v51 = vpop.xlane.xlu0 %723 }
 0x3e3   : > { %2423 = vrcp.f32 %v3135_v51  ;;  %v1279_v51 = vmul.f32 %v2416_v20, %v2994_v15 }
 0x3e6   : > { %v3137_v1 = vpop.xlane.xlu0 %733 }
 0x3ea   : > { %v3139_v19 = vpop.xlane.xlu0 %729 }
 0x3f3   : > { %v2241_v9 = vpop.trf.xlu1 }
 0x3f4   : > { %v2245_v5 = vunpack.i.h.bf16 %v2241_v9  ;;  %v2242_v44 = vunpack.i.l.bf16 %v2241_v9 }
 0x3f7   : > { %v2246_v21 = vpop.trf.xlu1 }
 0x3f8   : > { %v2250_v57 = vunpack.i.h.bf16 %v2246_v21  ;;  %v2247_v50 = vunpack.i.l.bf16 %v2246_v21  ;;  %v3141_v21 = vpop.xlane.xlu0 %735 }
 0x3fa   : > { %v823_v46 = vpack.c.bf16 %v2247_v50, %v2242_v44  ;;  %v1346_v22 = vpack.c.bf16 %v2250_v57, %v2245_v5 }
 0x3fb   : > { %v2251_v47 = vpop.trf.xlu1 }
 0x3fc   : > { %2063 = vmatprep.subr.bf16.mxu1 %v823_v46  ;;  %2113 = vmatprep.subr.bf16.mxu0 %v1346_v22  ;;  %v2255_v8 = vunpack.i.h.bf16 %v2251_v47  ;;  %v2252_v18 = vunpack.i.l.bf16 %v2251_v47 }
 0x3fd   : > { %2064 = vmatpush3.bf16.msra.mxu1 %v823_v46  ;;  %2114 = vmatpush3.bf16.msra.mxu0 %v1346_v22  ;;  %v3143_v22 = vpop.xlane.xlu0 %731 }
 0x3ff   : > { %v2256_v39 = vpop.trf.xlu1 }
 0x400   : > { %v2260_v59 = vunpack.i.h.bf16 %v2256_v39  ;;  %v2257_v58 = vunpack.i.l.bf16 %v2256_v39 }
 0x402   : > { %v824_v11 = vpack.c.bf16 %v2257_v58, %v2252_v18  ;;  %v1347_v52 = vpack.c.bf16 %v2260_v59, %v2255_v8 }
 0x403   : > { %v2261_v14 = vpop.trf.xlu1 }
 0x404   : > { %2065 = vmatprep.subr.bf16.mxu1 %v824_v11  ;;  %2115 = vmatprep.subr.bf16.mxu0 %v1347_v52  ;;  %v2265_v7 = vunpack.i.h.bf16 %v2261_v14  ;;  %v2262_v0 = vunpack.i.l.bf16 %v2261_v14  ;;  %v1241_v14 = vpop.xlane.xlu0 %1240 }
 0x405   : > { %2066 = vmatpush3.bf16.msra.mxu1 %v824_v11  ;;  %2116 = vmatpush3.bf16.msra.mxu0 %v1347_v52 }
 0x407   : > { %v2266_v9 = vpop.trf.xlu1 }
 0x408   : > { %v2270_v5 = vunpack.i.h.bf16 %v2266_v9  ;;  %v2267_v44 = vunpack.i.l.bf16 %v2266_v9  ;;  %v1243_v25 = vpop.xlane.xlu0 %1242 }
 0x409   : > { %2425 = vrcp.f32 %v1243_v25 }
 0x40a   : > { %v825_v57 = vpack.c.bf16 %v2267_v44, %v2262_v0  ;;  %v1348_v50 = vpack.c.bf16 %v2270_v5, %v2265_v7 }
 0x40b   : > { %v2271_v46 = vpop.trf.xlu1 }
 0x40c   : > { %2067 = vmatprep.subr.bf16.mxu1 %v825_v57  ;;  %2117 = vmatprep.subr.bf16.mxu0 %v1348_v50  ;;  %v2275_v47 = vunpack.i.h.bf16 %v2271_v46  ;;  %v2272_v8 = vunpack.i.l.bf16 %v2271_v46 }
 0x40d   : > { %2068 = vmatpush3.bf16.msra.mxu1 %v825_v57  ;;  %2118 = vmatpush3.bf16.msra.mxu0 %v1348_v50 }
 0x40f   : > { %v2276_v18 = vpop.trf.xlu1 }
 0x410   : > { %v2280_v39 = vunpack.i.h.bf16 %v2276_v18  ;;  %v2277_v59 = vunpack.i.l.bf16 %v2276_v18 }
 0x412   : > { %v826_v58 = vpack.c.bf16 %v2277_v59, %v2272_v8  ;;  %v1349_v11 = vpack.c.bf16 %v2280_v39, %v2275_v47 }
 0x413   : > { %v2281_v52 = vpop.trf.xlu1 }
 0x414   : > { %2069 = vmatprep.subr.bf16.mxu1 %v826_v58  ;;  %2119 = vmatprep.subr.bf16.mxu0 %v1349_v11  ;;  %v2285_v7 = vunpack.i.h.bf16 %v2281_v52  ;;  %v2282_v0 = vunpack.i.l.bf16 %v2281_v52 }
 0x415   : > { %2070 = vmatpush3.bf16.msra.mxu1 %v826_v58  ;;  %2120 = vmatpush3.bf16.msra.mxu0 %v1349_v11  ;;  %v1245_v58 = vpop.xlane.xlu0 %1244 }
 0x417   : > { %v2286_v9 = vpop.trf.xlu1 }
 0x418   : > { %v2290_v5 = vunpack.i.h.bf16 %v2286_v9  ;;  %v2287_v44 = vunpack.i.l.bf16 %v2286_v9 }
 0x419   : > { %v1247_v26 = vpop.xlane.xlu0 %1246 }
 0x41a   : > { %v827_v57 = vpack.c.bf16 %v2287_v44, %v2282_v0  ;;  %v1350_v50 = vpack.c.bf16 %v2290_v5, %v2285_v7  ;;  %2427 = vrcp.f32 %v1247_v26  ;;  %v1301_v26 = vmul.f32 %v3114_v10, %v1279_v51 }
 0x41b   : > { %v2291_v46 = vpop.trf.xlu1  ;;  %2429 = vrcp.f32 %v1241_v14 }
 0x41c   : > { %2071 = vmatprep.subr.bf16.mxu1 %v827_v57  ;;  %2121 = vmatprep.subr.bf16.mxu0 %v1350_v50  ;;  %v2295_v47 = vunpack.i.h.bf16 %v2291_v46  ;;  %v2292_v8 = vunpack.i.l.bf16 %v2291_v46  ;;  %2431 = vrcp.f32 %v1245_v58 }
 0x41d   : > { %2072 = vmatpush3.bf16.msra.mxu1 %v827_v57  ;;  %2122 = vmatpush3.bf16.msra.mxu0 %v1350_v50  ;;  %2433 = vrcp.f32 %v3133_v36 }
 0x41e   : > { %2435 = vrcp.f32 %v3143_v22 }
 0x41f   : > { %v2296_v18 = vpop.trf.xlu1  ;;  %2437 = vrcp.f32 %v3127_v41 }
 0x420   : > { %v2300_v39 = vunpack.i.h.bf16 %v2296_v18  ;;  %v2297_v59 = vunpack.i.l.bf16 %v2296_v18  ;;  %2439 = vrcp.f32 %v3139_v19 }
 0x421   : > { %2441 = vrcp.f32 %v3141_v21 }
 0x422   : > { %v828_v11 = vpack.c.bf16 %v2297_v59, %v2292_v8  ;;  %v1351_v52 = vpack.c.bf16 %v2300_v39, %v2295_v47  ;;  %v2418_v47 = vpop.eup %2417  ;;  %v1278_v8 = vmul.f32 %v2414_v55, %v2989_v13  ;;  %2443 = vrcp.f32 %v3137_v1 }
 0x423   : > { %v2301_v7 = vpop.trf.xlu1  ;;  %v2420_v60 = vpop.eup %2419  ;;  %v1281_v59 = vmul.f32 %v2418_v47, %v3002_v63  ;;  %v3351_v47 = vpack.c.bf16 %v3097_v38, %v3094_v62 }
 0x424   : > { %2073 = vmatprep.subr.bf16.mxu1 %v828_v11  ;;  %2123 = vmatprep.subr.bf16.mxu0 %v1351_v52  ;;  %v2305_v0 = vunpack.i.h.bf16 %v2301_v7  ;;  %v2302_v9 = vunpack.i.l.bf16 %v2301_v7  ;;  %v1280_v58 = vmul.f32 %v2420_v60, %v2998_v17 }
 0x425   : > { %2074 = vmatpush3.bf16.msra.mxu1 %v828_v11  ;;  %2124 = vmatpush3.bf16.msra.mxu0 %v1351_v52  ;;  %v2422_v11 = vpop.eup %2421 }
 0x426   : > { %v2424_v7 = vpop.eup %2423  ;;  %v1302_v17 = vmul.f32 %v3114_v10, %v1280_v58 }
 0x427   : > { %v2306_v40 = vpop.trf.xlu1  ;;  %v2426_v13 = vpop.eup %2425  ;;  %v762_v41 = vmul.f32 %v2424_v7, %v3010_v48 }
 0x428   : > { %v2310_v5 = vunpack.i.h.bf16 %v2306_v40  ;;  %v2307_v44 = vunpack.i.l.bf16 %v2306_v40  ;;  %v2428_v63 = vpop.eup %2427  ;;  %v1300_v40 = vmul.f32 %v3114_v10, %v1278_v8 }
 0x429   : > { %v2430_v36 = vpop.eup %2429  ;;  %v784_v24 = vmul.f32 %v3072_v16, %v762_v41 }
 0x42a   : > { %v829_v57 = vpack.c.bf16 %v2307_v44, %v2302_v9  ;;  %v1352_v50 = vpack.c.bf16 %v2310_v5, %v2305_v0  ;;  %v1303_v9 = vmul.f32 %v3114_v10, %v1281_v59  ;;  %v2432_v22 = vpop.eup %2431  ;;  %v1355_v5 = vpack.c.bf16 %v1301_v26, %v1300_v40 }
 0x42b   : > { %v2311_v46 = vpop.trf.xlu1  ;;  %v1283_v44 = vmul.f32 %v2426_v13, %v3037_v32  ;;  %v1282_v19 = vmul.f32 %v2430_v36, %v3033_v27  ;;  %v761_v32 = vmul.f32 %v2422_v11, %v2987_v6  ;;  %v1284_v48 = vmul.f32 %v2432_v22, %v3041_v29  ;;  %v1251_v11 = vpop.xlane.xlu0 %1250 }
 0x42c   : > { %2075 = vmatprep.subr.bf16.mxu1 %v829_v57  ;;  %2125 = vmatprep.subr.bf16.mxu0 %v1352_v50  ;;  %v2315_v18 = vunpack.i.h.bf16 %v2311_v46  ;;  %v2312_v39 = vunpack.i.l.bf16 %v2311_v46  ;;  %v1356_v55 = vpack.c.bf16 %v1303_v9, %v1302_v17 }
 0x42d   : > { %2076 = vmatpush3.bf16.msra.mxu1 %v829_v57  ;;  %2126 = vmatpush3.bf16.msra.mxu0 %v1352_v50  ;;  %v1285_v57 = vmul.f32 %v2428_v63, %v3048_v56  ;;  %v1305_v56 = vmul.f32 %v3114_v10, %v1283_v44  ;;  %v2434_v50 = vpop.eup %2433  ;;  %v783_v31 = vmul.f32 %v3072_v16, %v761_v32 }
 0x42e   : > { %v2436_v4 = vpop.eup %2435  ;;  %v1306_v43 = vmul.f32 %v3114_v10, %v1284_v48  ;;  %v764_v29 = vmul.f32 %v2434_v50, %v3006_v42  ;;  %v2324_v48 = vld [vmem:[%s3341_s4] sm:$0xff]  }
 0x42f   : > { %v2316_v25 = vpop.trf.xlu1  ;;  %v1307_v27 = vmul.f32 %v3114_v10, %v1285_v57  ;;  %v2438_v21 = vpop.eup %2437  ;;  %v835_v20 = vpack.c.bf16 %v784_v24, %v783_v31  ;;  %v766_v1 = vmul.f32 %v2436_v4, %v3029_v23 }
 0x430   : > { %v2320_v52 = vunpack.i.h.bf16 %v2316_v25  ;;  %v2317_v14 = vunpack.i.l.bf16 %v2316_v25  ;;  %v2440_v6 = vpop.eup %2439  ;;  %v763_v60 = vmul.f32 %v2438_v21, %v2980_v30  ;;  %v786_v8 = vmul.f32 %v3072_v16, %v764_v29  ;;  %v1253_v7 = vpop.xlane.xlu0 %1252 }
 0x431   : > { %v1358_v46 = vpack.c.bf16 %v1307_v27, %v1306_v43  ;;  %v765_v51 = vmul.f32 %v2440_v6, %v3019_v61  ;;  %v788_v42 = vmul.f32 %v3072_v16, %v766_v1 }
 0x432   : > { %v830_v15 = vpack.c.bf16 %v2317_v14, %v2312_v39  ;;  %v1353_v0 = vpack.c.bf16 %v2320_v52, %v2315_v18  ;;  %v2442_v18 = vpop.eup %2441  ;;  %v785_v39 = vmul.f32 %v3072_v16, %v763_v60 }
 0x433   : > { %v2444_v25 = vpop.eup %2443  ;;  %v787_v23 = vmul.f32 %v3072_v16, %v765_v51  ;;  %v768_v62 = vmul.f32 %v2442_v18, %v3025_v12 }
 0x434   : > { %2077 = vmatprep.subr.bf16.mxu1 %v830_v15  ;;  %2127 = vmatprep.subr.bf16.mxu0 %v1353_v0  ;;  %v836_v59 = vpack.c.bf16 %v786_v8, %v785_v39  ;;  %v767_v30 = vmul.f32 %v2444_v25, %v3015_v2  ;;  %v1257_v58 = vpop.xlane.xlu0 %1256 }
 0x435   : > { %2078 = vmatpush3.bf16.msra.mxu1 %v830_v15  ;;  %2128 = vmatpush3.bf16.msra.mxu0 %v1353_v0  ;;  %v837_v38 = vpack.c.bf16 %v788_v42, %v787_v23  ;;  %v790_v61 = vmul.f32 %v3072_v16, %v768_v62 }
 0x436   : > { %v789_v52 = vmul.f32 %v3072_v16, %v767_v30  ;;  %2179 = vmatprep.subr.bf16.mxu1 %v2324_v48  ;;  %2145 = vmatprep.subr.bf16.mxu0 %v2324_v48 }
 0x438   : > { %2080 = vmatmul.mubr.bf16.vlgmr.msra.gmra.mrb[16].mxu1 %v832_v54  ;;  %2130 = vmatmul.mubr.bf16.vlgmr.msra.gmra.mrb[28].mxu0 %v1355_v5  ;;  %v1304_v54 = vmul.f32 %v3114_v10, %v1282_v19  ;;  %v838_v14 = vpack.c.bf16 %v790_v61, %v789_v52  ;;  %v1255_v26 = vpop.xlane.xlu0 %1254 }
 0x439   : > { %2083 = vmatprep.mubr.bf16.mxu1 %v833_v28  ;;  %2133 = vmatprep.mubr.bf16.mxu0 %v1356_v55  ;;  %2445 = vrcp.f32 %v1255_v26 }
 0x43a   : > { %v1357_v28 = vpack.c.bf16 %v1305_v56, %v1304_v54  ;;  %2447 = vrcp.f32 %v1251_v11  ;;  %2180 = vmatpush3.bf16.msra.mxu1 %v2324_v48  ;;  %2146 = vmatpush3.bf16.msra.mxu0 %v2324_v48 }
 0x43b   : > { %2449 = vrcp.f32 %v1253_v7 }
 0x43c   : > { %v1259_v15 = vpop.xlane.xlu0 %1258 }
 0x440   : > { %2084 = vmatmul.mubr.bf16.gmra.mrb[20].mxu1 %v3351_v47  ;;  %2134 = vmatmul.mubr.bf16.gmra.mrb[32].mxu0 %v1357_v28 }
 0x441   : > { %2087 = vmatprep.mubr.bf16.mxu1 %v835_v20  ;;  %2137 = vmatprep.mubr.bf16.mxu0 %v1358_v46 }
 0x443   : > { %v2446_v2 = vpop.eup %2445 }
 0x444   : > { %v2448_v0 = vpop.eup %2447  ;;  %v1289_v9 = vmul.f32 %v2446_v2, %v3064_v35 }
 0x445   : > { %v2450_v13 = vpop.eup %2449  ;;  %v1287_v16 = vmul.f32 %v2448_v0, %v3055_v53 }
 0x446   : > { %v1288_v40 = vmul.f32 %v2450_v13, %v3058_v33  ;;  %v1311_v22 = vmul.f32 %v3114_v10, %v1289_v9 }
 0x447   : > { %v1309_v44 = vmul.f32 %v3114_v10, %v1287_v16 }
 0x448   : > { %2088 = vmatmul.mubr.bf16.gmra.mrb[24].mxu1 %v836_v59  ;;  %v1310_v41 = vmul.f32 %v3114_v10, %v1288_v40 }
 0x449   : > { %2091 = vmatprep.mubr.bf16.mxu1 %v837_v38 }
 0x44a   : > { %v1360_v19 = vpack.c.bf16 %v1311_v22, %v1310_v41 }
 0x450   : > { %2092 = vmatmul.mubr.bf16.gmra.mrb[28].mxu1 %v838_v14 }
 0x463   : > { %v1249_v12 = vpop.xlane.xlu1 %1248 }
 0x464   : > { %2451 = vrcp.f32 %v1249_v12 }
 0x465   : > { %2453 = vrcp.f32 %v1259_v15 }
 0x466   : > { %2455 = vrcp.f32 %v1257_v58 }
 0x46e   : > { %v2452_v63 = vpop.eup %2451 }
 0x46f   : > { %v1286_v36 = vmul.f32 %v2452_v63, %v3110_v3  ;;  %v2454_v17 = vpop.eup %2453 }
 0x470   : > { %v2456_v55 = vpop.eup %2455  ;;  %v1291_v35 = vmul.f32 %v2454_v17, %v3067_v37 }
 0x471   : > { %v1308_v5 = vmul.f32 %v3114_v10, %v1286_v36  ;;  %v1290_v53 = vmul.f32 %v2456_v55, %v3061_v34 }
 0x472   : > { %v1313_v33 = vmul.f32 %v3114_v10, %v1291_v35 }
 0x473   : > { %v1359_v57 = vpack.c.bf16 %v1309_v44, %v1308_v5  ;;  %v1312_v3 = vmul.f32 %v3114_v10, %v1290_v53 }
 0x475   : > { %2138 = vmatmul.mubr.bf16.gmra.mrb[36].mxu0 %v1359_v57  ;;  %v1361_v32 = vpack.c.bf16 %v1313_v33, %v1312_v3 }
 0x476   : > { %2141 = vmatprep.mubr.bf16.mxu0 %v1360_v19 }
 0x47d   : > { %2142 = vmatmul.mubr.bf16.gmra.mrb[40].mxu0 %v1361_v32 }
 0x50b   : > { %v2081_v37 = vpop.f32.mrb[16].mxu1  ;;  %v2131_v56 = vpop.f32.mrb[28].mxu0 }
 0x50c   : > { %v873_v50 = vpop.f32.mrb[17].mxu1  ;;  %v1396_v24 = vpop.f32.mrb[29].mxu0  ;;  %v938_v4 = vmax.f32 %v2081_v37, 0.0  ;;  %v1461_v54 = vmax.f32 %v2131_v56, 0.0 }
 0x50d   : > { %v2082_v34 = vpop.f32.mrb[18].mxu1  ;;  %v2132_v27 = vpop.f32.mrb[30].mxu0  ;;  %v936_v6 = vmax.f32 %v873_v50, 0.0  ;;  %v1459_v28 = vmax.f32 %v1396_v24, 0.0 }
 0x50e   : > { %v939_v21 = vmax.f32 %v2082_v34, 0.0  ;;  %v1462_v10 = vmax.f32 %v2132_v27, 0.0  ;;  %v876_v31 = vpop.f32.mrb[19].mxu1  ;;  %v1399_v43 = vpop.f32.mrb[31].mxu0 }
 0x50f   : > { %v937_v29 = vmax.f32 %v876_v31, 0.0  ;;  %v1460_v20 = vmax.f32 %v1399_v43, 0.0 }
 0x510   : > { %v953_v46 = vpack.c.bf16 %v939_v21, %v938_v4  ;;  %v1476_v1 = vpack.c.bf16 %v1462_v10, %v1461_v54 }
 0x511   : > { %v952_v47 = vpack.c.bf16 %v937_v29, %v936_v6  ;;  %v1475_v60 = vpack.c.bf16 %v1460_v20, %v1459_v28 }
 0x512   : > { %961 = vst.msk [vmem:[#allocation3 + $0x8] sm:$0xff] %vm503_vm1, %v953_v46  ;;  %1485 = vst.msk [vmem:[#allocation3 + $0x48] sm:$0xff] %vm503_vm1, %v1476_v1 }
 0x513   : > { %960 = vst.msk [vmem:[#allocation3] sm:$0xff] %vm503_vm1, %v952_v47  ;;  %1484 = vst.msk [vmem:[#allocation3 + $0x40] sm:$0xff] %vm503_vm1, %v1475_v60  ;;  %v2085_v51 = vpop.f32.mrb[20].mxu1  ;;  %v2135_v8 = vpop.f32.mrb[32].mxu0 }
 0x514   : > { %v889_v18 = vpop.f32.mrb[21].mxu1  ;;  %v1412_v42 = vpop.f32.mrb[33].mxu0  ;;  %v942_v23 = vmax.f32 %v2085_v51, 0.0  ;;  %v1465_v59 = vmax.f32 %v2135_v8, 0.0 }
 0x515   : > { %v2086_v39 = vpop.f32.mrb[22].mxu1  ;;  %v2136_v25 = vpop.f32.mrb[34].mxu0  ;;  %v940_v61 = vmax.f32 %v889_v18, 0.0  ;;  %v1463_v52 = vmax.f32 %v1412_v42, 0.0 }
 0x516   : > { %v943_v62 = vmax.f32 %v2086_v39, 0.0  ;;  %v1466_v38 = vmax.f32 %v2136_v25, 0.0  ;;  %v892_v30 = vpop.f32.mrb[23].mxu1  ;;  %v1415_v11 = vpop.f32.mrb[35].mxu0 }
 0x517   : > { %v941_v14 = vmax.f32 %v892_v30, 0.0  ;;  %v1464_v7 = vmax.f32 %v1415_v11, 0.0 }
 0x518   : > { %v955_v58 = vpack.c.bf16 %v943_v62, %v942_v23  ;;  %v1478_v26 = vpack.c.bf16 %v1466_v38, %v1465_v59 }
 0x519   : > { %v954_v15 = vpack.c.bf16 %v941_v14, %v940_v61  ;;  %v1477_v12 = vpack.c.bf16 %v1464_v7, %v1463_v52  ;;  %v1493_v13 = vld [vmem:[#allocation3 + $0x8] sm:$0xff]  ;;  %v3248_v14 = vld [vmem:[%s3342_s5] ss:$0 sm:$0xff] }
 0x51a   : > { %963 = vst.msk [vmem:[#allocation3 + $0x18] sm:$0xff] %vm503_vm1, %v955_v58  ;;  %1487 = vst.msk [vmem:[#allocation3 + $0x58] sm:$0xff] %vm503_vm1, %v1478_v26  ;;  %v1492_v2 = vld [vmem:[#allocation3] sm:$0xff]  ;;  %v1501_v54 = vld [vmem:[#allocation3 + $0x48] sm:$0xff] }
 0x51b   : > { %962 = vst.msk [vmem:[#allocation3 + $0x10] sm:$0xff] %vm503_vm1, %v954_v15  ;;  %1486 = vst.msk [vmem:[#allocation3 + $0x50] sm:$0xff] %vm503_vm1, %v1477_v12  ;;  %v2089_v0 = vpop.f32.mrb[24].mxu1  ;;  %2147 = vmatprep.mubr.msk.bf16.mxu0 %vm503_vm1, %v1492_v2  ;;  %v1500_v4 = vld [vmem:[#allocation3 + $0x40] sm:$0xff] }
 0x51c   : > { %v905_v9 = vpop.f32.mrb[25].mxu1  ;;  %2148 = vmatmul.mubr.msk.bf16.vlgmr.msra.gmra.mrb[44].mxu0 %vm503_vm1, %v1493_v13  ;;  %v946_v63 = vmax.f32 %v2089_v0, 0.0 }
 0x51d   : > { %v2090_v16 = vpop.f32.mrb[26].mxu1  ;;  %v944_v17 = vmax.f32 %v905_v9, 0.0 }
 0x51e   : > { %v947_v40 = vmax.f32 %v2090_v16, 0.0  ;;  %v908_v36 = vpop.f32.mrb[27].mxu1 }
 0x51f   : > { %v945_v22 = vmax.f32 %v908_v36, 0.0 }
 0x520   : > { %v957_v5 = vpack.c.bf16 %v947_v40, %v946_v63 }
 0x521   : > { %v956_v44 = vpack.c.bf16 %v945_v22, %v944_v17  ;;  %v1495_v57 = vld [vmem:[#allocation3 + $0x18] sm:$0xff] }
 0x522   : > { %965 = vst.msk [vmem:[#allocation3 + $0x28] sm:$0xff] %vm503_vm1, %v957_v5  ;;  %v1494_v55 = vld [vmem:[#allocation3 + $0x10] sm:$0xff]  ;;  %v1503_v10 = vld [vmem:[#allocation3 + $0x58] sm:$0xff] }
 0x523   : > { %964 = vst.msk [vmem:[#allocation3 + $0x20] sm:$0xff] %vm503_vm1, %v956_v44  ;;  %v2093_v41 = vpop.f32.mrb[28].mxu1  ;;  %2151 = vmatprep.mubr.msk.bf16.mxu0 %vm503_vm1, %v1494_v55  ;;  %v1502_v21 = vld [vmem:[#allocation3 + $0x50] sm:$0xff] }
 0x524   : > { %v921_v35 = vpop.f32.mrb[29].mxu1  ;;  %2152 = vmatmul.mubr.msk.bf16.gmra.mrb[48].mxu0 %vm503_vm1, %v1495_v57  ;;  %v950_v53 = vmax.f32 %v2093_v41, 0.0 }
 0x525   : > { %v2094_v19 = vpop.f32.mrb[30].mxu1  ;;  %v948_v32 = vmax.f32 %v921_v35, 0.0 }
 0x526   : > { %v951_v33 = vmax.f32 %v2094_v19, 0.0  ;;  %v924_v3 = vpop.f32.mrb[31].mxu1 }
 0x527   : > { %v949_v48 = vmax.f32 %v924_v3, 0.0 }
 0x528   : > { %v959_v37 = vpack.c.bf16 %v951_v33, %v950_v53 }
 0x529   : > { %v958_v56 = vpack.c.bf16 %v949_v48, %v948_v32  ;;  %v1497_v24 = vld [vmem:[#allocation3 + $0x28] sm:$0xff] }
 0x52a   : > { %967 = vst.msk [vmem:[#allocation3 + $0x38] sm:$0xff] %vm503_vm1, %v959_v37  ;;  %v1496_v50 = vld [vmem:[#allocation3 + $0x20] sm:$0xff] }
 0x52b   : > { %966 = vst.msk [vmem:[#allocation3 + $0x30] sm:$0xff] %vm503_vm1, %v958_v56  ;;  %2155 = vmatprep.mubr.msk.bf16.mxu1 %vm503_vm1, %v1496_v50 }
 0x52c   : > { %2156 = vmatmul.mubr.msk.bf16.vlgmr.msra.gmra.mrb[32].mxu1 %vm503_vm1, %v1497_v24 }
 0x531   : > { %v1499_v27 = vld [vmem:[#allocation3 + $0x38] sm:$0xff] }
 0x532   : > { %v1498_v34 = vld [vmem:[#allocation3 + $0x30] sm:$0xff] }
 0x533   : > { %2159 = vmatprep.mubr.msk.bf16.mxu1 %vm503_vm1, %v1498_v34 }
 0x534   : > { %2160 = vmatmul.mubr.msk.bf16.gmra.mrb[36].mxu1 %vm503_vm1, %v1499_v27 }
 0x535   : > { %2163 = vmatprep.mubr.msk.bf16.mxu1 %vm503_vm1, %v1500_v4 }
 0x53c   : > { %2164 = vmatmul.mubr.msk.bf16.gmra.mrb[40].mxu1 %vm503_vm1, %v1501_v54 }
 0x53d   : > { %2167 = vmatprep.mubr.msk.bf16.mxu1 %vm503_vm1, %v1502_v21 }
 0x544   : > { %2168 = vmatmul.mubr.msk.bf16.gmra.mrb[44].mxu1 %vm503_vm1, %v1503_v10 }
 0x548   : > { %v2139_v31 = vpop.f32.mrb[36].mxu0 }
 0x549   : > { %v1428_v43 = vpop.f32.mrb[37].mxu0  ;;  %v1469_v28 = vmax.f32 %v2139_v31, 0.0 }
 0x54a   : > { %v2140_v6 = vpop.f32.mrb[38].mxu0  ;;  %v1467_v46 = vmax.f32 %v1428_v43, 0.0 }
 0x54b   : > { %v1470_v29 = vmax.f32 %v2140_v6, 0.0  ;;  %v1431_v20 = vpop.f32.mrb[39].mxu0 }
 0x54c   : > { %v1468_v1 = vmax.f32 %v1431_v20, 0.0 }
 0x54d   : > { %v1480_v47 = vpack.c.bf16 %v1470_v29, %v1469_v28 }
 0x54e   : > { %v1479_v60 = vpack.c.bf16 %v1468_v1, %v1467_v46 }
 0x54f   : > { %1489 = vst.msk [vmem:[#allocation3 + $0x68] sm:$0xff] %vm503_vm1, %v1480_v47 }
 0x550   : > { %1488 = vst.msk [vmem:[#allocation3 + $0x60] sm:$0xff] %vm503_vm1, %v1479_v60  ;;  %v2143_v51 = vpop.f32.mrb[40].mxu0 }
 0x551   : > { %v1444_v8 = vpop.f32.mrb[41].mxu0  ;;  %v1473_v42 = vmax.f32 %v2143_v51, 0.0 }
 0x552   : > { %v2144_v18 = vpop.f32.mrb[42].mxu0  ;;  %v1471_v23 = vmax.f32 %v1444_v8, 0.0 }
 0x553   : > { %v1474_v39 = vmax.f32 %v2144_v18, 0.0  ;;  %v1447_v25 = vpop.f32.mrb[43].mxu0 }
 0x554   : > { %v1472_v59 = vmax.f32 %v1447_v25, 0.0 }
 0x555   : > { %v1482_v62 = vpack.c.bf16 %v1474_v39, %v1473_v42 }
 0x556   : > { %v1481_v38 = vpack.c.bf16 %v1472_v59, %v1471_v23  ;;  %v1505_v11 = vld [vmem:[#allocation3 + $0x68] sm:$0xff] }
 0x557   : > { %1491 = vst.msk [vmem:[#allocation3 + $0x78] sm:$0xff] %vm503_vm1, %v1482_v62  ;;  %v1504_v30 = vld [vmem:[#allocation3 + $0x60] sm:$0xff] }
 0x558   : > { %1490 = vst.msk [vmem:[#allocation3 + $0x70] sm:$0xff] %vm503_vm1, %v1481_v38  ;;  %2171 = vmatprep.mubr.msk.bf16.mxu1 %vm503_vm1, %v1504_v30 }
 0x559   : > { %2172 = vmatmul.mubr.msk.bf16.gmra.mrb[48].mxu1 %vm503_vm1, %v1505_v11 }
 0x55e   : > { %v1507_v52 = vld [vmem:[#allocation3 + $0x78] sm:$0xff] }
 0x55f   : > { %v1506_v61 = vld [vmem:[#allocation3 + $0x70] sm:$0xff] }
 0x560   : > { %2175 = vmatprep.mubr.msk.bf16.mxu1 %vm503_vm1, %v1506_v61 }
 0x561   : > { %2176 = vmatmul.mubr.msk.bf16.gmra.mrb[52].mxu1 %vm503_vm1, %v1507_v52 }
 0x5ef   : > { %v2149_v7 = vpop.f32.mrb[44].mxu0 }
 0x5f0   : > { %v1605_v58 = vpop.f32.mrb[45].mxu0  ;;  %v1614_v9 = vadd.f32 %v2149_v7, %v3248_v14 }
 0x5f1   : > { %v1606_v26 = vadd.f32 %v3248_v14, %v1605_v58  ;;  %v2150_v15 = vpop.f32.mrb[46].mxu0 }
 0x5f2   : > { %v1608_v12 = vpop.f32.mrb[47].mxu0  ;;  %v1617_v40 = vadd.f32 %v2150_v15, %v3248_v14  ;;  %v1796_v15 = vld [vmem:[%s2786_s26] sm:$0x3]  ;;  %s2493_s26 = scalar_lea.vmem %s2492_s17, 2048 }
 0x5f3   : > { %1732 = vxpose.xlu0.b32.start [1/16] (narrow) %v1606_v26, 32  ;;  %v1609_v2 = vadd.f32 %v3248_v14, %v1608_v12  ;;  %v1801_v12 = vrot.slane %v1796_v15, %v2799_v49  ;;  %p2495_p1 = scmp.lt.s32.totalorder %s2493_s26, %s2487_s15 }
 0x5f5   : > { %p2496_p3 = por %p2495_p1, %p2494_p10 }
 0x5f7   : > { %v2153_v0 = vpop.f32.mrb[48].mxu0  ;;  %1733 = vxpose.xlu0.b32.cont [2/16] (narrow) %v1609_v2, 32  ;;  %p2497_p5 = pnand %p2496_p3, %p2490_p4 }
 0x5f8   : > { %v1621_v13 = vpop.f32.mrb[49].mxu0  ;;  %v1630_v35 = vadd.f32 %v2153_v0, %v3248_v14 }
 0x5f9   : > { %v2154_v16 = vpop.f32.mrb[50].mxu0  ;;  %v1622_v22 = vadd.f32 %v3248_v14, %v1621_v13 }
 0x5fa   : > { %v1624_v63 = vpop.f32.mrb[51].mxu0  ;;  %v1633_v33 = vadd.f32 %v2154_v16, %v3248_v14 }
 0x5fb   : > { %1734 = vxpose.xlu0.b32.cont [3/16] (narrow) %v1614_v9, 32  ;;  %v1625_v55 = vadd.f32 %v3248_v14, %v1624_v63 }
 0x5ff   : > { %v2157_v36 = vpop.f32.mrb[32].mxu1  ;;  %1735 = vxpose.xlu0.b32.cont [4/16] (narrow) %v1617_v40, 32 }
 0x600   : > { %v1637_v17 = vpop.f32.mrb[33].mxu1  ;;  %v1646_v54 = vadd.f32 %v2157_v36, %v3248_v14 }
 0x601   : > { %v2158_v5 = vpop.f32.mrb[34].mxu1  ;;  %v1638_v48 = vadd.f32 %v3248_v14, %v1637_v17 }
 0x602   : > { %v1640_v44 = vpop.f32.mrb[35].mxu1  ;;  %v1649_v43 = vadd.f32 %v2158_v5, %v3248_v14 }
 0x603   : > { %1736 = vxpose.xlu0.b32.cont [5/16] (narrow) %v1622_v22, 32  ;;  %v1641_v24 = vadd.f32 %v3248_v14, %v1640_v44 }
 0x607   : > { %v2161_v41 = vpop.f32.mrb[36].mxu1  ;;  %1737 = vxpose.xlu0.b32.cont [6/16] (narrow) %v1625_v55, 32 }
 0x608   : > { %v1653_v57 = vpop.f32.mrb[37].mxu1  ;;  %v1662_v1 = vadd.f32 %v2161_v41, %v3248_v14 }
 0x609   : > { %v2162_v19 = vpop.f32.mrb[38].mxu1  ;;  %v1654_v28 = vadd.f32 %v3248_v14, %v1653_v57 }
 0x60a   : > { %v1656_v53 = vpop.f32.mrb[39].mxu1  ;;  %v1665_v51 = vadd.f32 %v2162_v19, %v3248_v14 }
 0x60b   : > { %1738 = vxpose.xlu0.b32.cont [7/16] (narrow) %v1630_v35, 32  ;;  %v1657_v20 = vadd.f32 %v3248_v14, %v1656_v53 }
 0x60f   : > { %v2165_v3 = vpop.f32.mrb[40].mxu1  ;;  %1739 = vxpose.xlu0.b32.cont [8/16] (narrow) %v1633_v33, 32 }
 0x610   : > { %v1669_v32 = vpop.f32.mrb[41].mxu1  ;;  %v1678_v21 = vadd.f32 %v2165_v3, %v3248_v14 }
 0x611   : > { %v1670_v37 = vadd.f32 %v3248_v14, %v1669_v32  ;;  %v2166_v56 = vpop.f32.mrb[42].mxu1 }
 0x612   : > { %v1672_v50 = vpop.f32.mrb[43].mxu1  ;;  %v1681_v6 = vadd.f32 %v2166_v56, %v3248_v14 }
 0x613   : > { %1764 = vxpose.xlu1.b32.start [1/16] (narrow) %v1670_v37, 32  ;;  %1740 = vxpose.xlu0.b32.cont [9/16] (narrow) %v1638_v48, 32  ;;  %v1673_v34 = vadd.f32 %v3248_v14, %v1672_v50 }
 0x617   : > { %1765 = vxpose.xlu1.b32.cont [2/16] (narrow) %v1673_v34, 32  ;;  %v2169_v27 = vpop.f32.mrb[44].mxu1  ;;  %1741 = vxpose.xlu0.b32.cont [10/16] (narrow) %v1641_v24, 32 }
 0x618   : > { %v1685_v4 = vpop.f32.mrb[45].mxu1  ;;  %v1694_v47 = vadd.f32 %v2169_v27, %v3248_v14 }
 0x619   : > { %v2170_v10 = vpop.f32.mrb[46].mxu1  ;;  %v1686_v29 = vadd.f32 %v3248_v14, %v1685_v4 }
 0x61a   : > { %v1688_v31 = vpop.f32.mrb[47].mxu1  ;;  %v1697_v8 = vadd.f32 %v2170_v10, %v3248_v14 }
 0x61b   : > { %1766 = vxpose.xlu1.b32.cont [3/16] (narrow) %v1678_v21, 32  ;;  %1742 = vxpose.xlu0.b32.cont [11/16] (narrow) %v1646_v54, 32  ;;  %v1689_v46 = vadd.f32 %v3248_v14, %v1688_v31 }
 0x61f   : > { %1767 = vxpose.xlu1.b32.cont [4/16] (narrow) %v1681_v6, 32  ;;  %1743 = vxpose.xlu0.b32.cont [12/16] (narrow) %v1649_v43, 32 }
 0x623   : > { %1768 = vxpose.xlu1.b32.cont [5/16] (narrow) %v1686_v29, 32  ;;  %1744 = vxpose.xlu0.b32.cont [13/16] (narrow) %v1654_v28, 32 }
 0x627   : > { %1769 = vxpose.xlu1.b32.cont [6/16] (narrow) %v1689_v46, 32  ;;  %1745 = vxpose.xlu0.b32.cont [14/16] (narrow) %v1657_v20, 32 }
 0x62b   : > { %1770 = vxpose.xlu1.b32.cont [7/16] (narrow) %v1694_v47, 32  ;;  %1746 = vxpose.xlu0.b32.cont [15/16] (narrow) %v1662_v1, 32 }
 0x62c   : > { %v2173_v60 = vpop.f32.mrb[48].mxu1 }
 0x62d   : > { %v1701_v18 = vpop.f32.mrb[49].mxu1  ;;  %v1710_v11 = vadd.f32 %v2173_v60, %v3248_v14 }
 0x62e   : > { %v2174_v42 = vpop.f32.mrb[50].mxu1  ;;  %v1702_v25 = vadd.f32 %v3248_v14, %v1701_v18 }
 0x62f   : > { %1771 = vxpose.xlu1.b32.cont [8/16] (narrow) %v1697_v8, 32  ;;  %v1704_v39 = vpop.f32.mrb[51].mxu1  ;;  %1747 = vxpose.xlu0.b32.end [16/16] (narrow) %v1665_v51, 32  ;;  %v1713_v61 = vadd.f32 %v2174_v42, %v3248_v14 }
 0x630   : > { %v1705_v59 = vadd.f32 %v3248_v14, %v1704_v39 }
 0x633   : > { %1772 = vxpose.xlu1.b32.cont [9/16] (narrow) %v1702_v25, 32 }
 0x634   : > { %v2177_v23 = vpop.f32.mrb[52].mxu1 }
 0x635   : > { %v1717_v62 = vpop.f32.mrb[53].mxu1  ;;  %v1726_v58 = vadd.f32 %v2177_v23, %v3248_v14 }
 0x636   : > { %v2178_v38 = vpop.f32.mrb[54].mxu1  ;;  %v1718_v52 = vadd.f32 %v3248_v14, %v1717_v62 }
 0x637   : > { %1773 = vxpose.xlu1.b32.cont [10/16] (narrow) %v1705_v59, 32  ;;  %v1720_v30 = vpop.f32.mrb[55].mxu1  ;;  %v1729_v26 = vadd.f32 %v2178_v38, %v3248_v14 }
 0x638   : > { %v1721_v7 = vadd.f32 %v3248_v14, %v1720_v30  ;;  %v1804_v14 = vsub.s32 1, %v2796_v45 }
 0x63a   : > { %v1805_v17 = vrot.slane %v1796_v15, %v1804_v14 }
 0x63b   : > { %1774 = vxpose.xlu1.b32.cont [11/16] (narrow) %v1710_v11, 32 }
 0x63f   : > { %1775 = vxpose.xlu1.b32.cont [12/16] (narrow) %v1713_v61, 32 }
 0x643   : > { %1776 = vxpose.xlu1.b32.cont [13/16] (narrow) %v1718_v52, 32 }
 0x647   : > { %1777 = vxpose.xlu1.b32.cont [14/16] (narrow) %v1721_v7, 32 }
 0x64b   : > { %1778 = vxpose.xlu1.b32.cont [15/16] (narrow) %v1726_v58, 32 }
 0x64f   : > { %1779 = vxpose.xlu1.b32.end [16/16] (narrow) %v1729_v26, 32 }
 0x673   : > { %v1748_v2 = vpop.trf.xlu0 }
 0x674   : > { %v1808_v0 = vmul.f32 %v1801_v12, %v1748_v2 }
 0x676   : > { %1816 = vst [vmem:[%s283_s16] sm:$0xff] %v1808_v0 }
 0x677   : > { %v1749_v13 = vpop.trf.xlu0 }
 0x678   : > { %v1810_v9 = vmul.f32 %v1801_v12, %v1749_v13 }
 0x67a   : > { %1818 = vst [vmem:[%s283_s16 + $0x10] sm:$0xff] %v1810_v9 }
 0x67b   : > { %v1750_v16 = vpop.trf.xlu0 }
 0x67c   : > { %v1812_v63 = vmul.f32 %v1801_v12, %v1750_v16 }
 0x67e   : > { %1820 = vst [vmem:[%s283_s16 + $0x20] sm:$0xff] %v1812_v63 }
 0x67f   : > { %v1751_v40 = vpop.trf.xlu0 }
 0x680   : > { %v1814_v36 = vmul.f32 %v1801_v12, %v1751_v40 }
 0x682   : > { %1822 = vst [vmem:[%s283_s16 + $0x30] sm:$0xff] %v1814_v36 }
 0x693   : > { %v1780_v22 = vpop.trf.xlu1 }
 0x694   : > { %v1809_v49 = vmul.f32 %v1805_v17, %v1780_v22 }
 0x696   : > { %1817 = vst [vmem:[%s283_s16 + $0x8] sm:$0xff] %v1809_v49 }
 0x697   : > { %v1781_v5 = vpop.trf.xlu1 }
 0x698   : > { %v1811_v44 = vmul.f32 %v1805_v17, %v1781_v5 }
 0x69a   : > { %1819 = vst [vmem:[%s283_s16 + $0x18] sm:$0xff] %v1811_v44 }
 0x69b   : > { %v1782_v55 = vpop.trf.xlu1 }
 0x69c   : > { %v1813_v41 = vmul.f32 %v1805_v17, %v1782_v55 }
 0x69e   : > { %1821 = vst [vmem:[%s283_s16 + $0x28] sm:$0xff] %v1813_v41 }
 0x69f   : > { %v1783_v45 = vpop.trf.xlu1 }
 0x6a0   : > { %v1815_v57 = vmul.f32 %v1805_v17, %v1783_v45 }
 0x6a2   : > { %1823 = vst [vmem:[%s283_s16 + $0x38] sm:$0xff] %v1815_v57 }
 0x6a3   : > { %2500 = shalt.err (!%p2497_p5)
}
 0x6a4   : > { %s2501_s28 = scalar_lea.hbm %s3293_s20, 1024  ;;  %s2505_s11 = scalar_lea.hbm %s3343_s6, 2048 }
 0x6a5   : > { %p2502_p7 = scmp.ne.s32.totalorder %s3293_s20, %s2501_s28  ;;  %p2506_p0 = scmp.lt.u32.totalorder %s3293_s20, %s3343_s6 }
 0x6a6   : > { %p2507_p2 = scmp.lt.u32.totalorder %s2505_s11, %s2501_s28  ;;  %p2509_p11 = scmp.lt.u32.totalorder %s2501_s28, %s3293_s20 }
 0x6a7   : > { %p2503_p8 = pnand %p2502_p7, %p3352_p12 }
 0x6a8   : > { %p2508_p6 = por %p2507_p2, %p2506_p0 }
 0x6a9   : > { %p2504_p9 = pneg %p2503_p8 }
 0x6aa   : > { %p2510_p13 = por %p2509_p11, %p2508_p6 }
 0x6ac   : > { %p2511_p4 = pnand %p2510_p13, %p2504_p9 }
 0x6ae   : > { %2514 = shalt.err (!%p2511_p4)
}
 0x6af   : > { %s2561_s8 = smov 256   ;;  %s2562_s19 = smov 512  }
 0x6b0   : > { %s2563_s15 = smov 16  }
 0x6b1   : > { %2183 = dma.vmem_to_hbm [thread:$0]  (%p3352_p12), %s3288_s12, 1024, %s3293_s20, %s1825_s14, %s2561_s8, %s2562_s19, %s2563_s15  }
 0x6b2 PF: > { %s1853_s25 = sand.u32 1, %s2541_s21   ;;  %p3353_p10 = scmp.ne.s32.totalorder %s3348_s10, 0 }
 0x6b3   : > { %p3354_p1 = scmp.ge.s32.totalorder %s2553_s24, 2  ;;  %s1854_s17 = scalar_lea.sflag [#allocation6], %s1853_s25 }
 0x6b5   : > { %p2190_p3 = pnand %p3354_p1, %p3353_p10 }
 0x6b7   : > { %2536 = dma.done.wait (!%p2190_p3), %s1854_s17, 1024  }
 0x6b8   : > { %2538 = vsyncadd (!%p2190_p3), %s1854_s17, 4294966272  ;;  %p19_p5 = scmp.ge.s32.totalorder %s2624_s27, 4   ;;  %s3355_s21 = smov %s2545_s22 }
 0x6b9   : > { %s3356_s22 = smov %s2549_s23  ;;  %s3357_s23 = smov %s2636_s30 }
 0x6ba   : > { %s3358_s24 = smov %s2624_s27  ;;  %21 = sbr.rel (!%p19_p5) target bundleno = 5 (0x5), region = 95 }
 0x6c1   :  { %1859 = vsyncpa [#allocation5], 1 }
 0x6c2   :  { %1861 = vsyncpa [#allocation5 + $0x1], 1 }
 0x6c3   :  { %1862 = vsyncpa [#allocation6], 1 }
 0x6c4   :  { %1864 = vsyncpa [#allocation6 + $0x1], 1 }

</bundles_post_ra>
